<compile_context>
chip_gen: v7x
topology: tpu7x:2x2x1
jax: 0.10.0
libtpu: 0.0.40
codegen_flags: <defaults>
</compile_context>

<pallas_src>
import jax
import jax.numpy as jnp
from jax.experimental import pallas as pl
from jax.experimental.pallas import tpu as pltpu

N_LATENT = 2
H1 = 100
H2 = 500
N_OUT = 263 * 23          # 6049
BN_EPS = 1e-5
TILE_N = 1536             # lane-aligned output tile; grid = ceil(6049/1536) = 4


def _batchnorm_train(x, gamma, beta):
    # training-mode BatchNorm1d: biased batch statistics over axis 0
    # (matches the PyTorch module right after __init__; output depends on the
    #  batch composition by design).
    mean = jnp.mean(x, axis=0, keepdims=True)
    var = jnp.mean((x - mean) ** 2, axis=0, keepdims=True)
    return (x - mean) * jax.lax.rsqrt(var + BN_EPS) * gamma + beta


# -----------------------------------------------------------------------------
# Fused kernel: (BN1 -> L1 -> ReLU -> BN2 -> L2 -> ReLU -> BN3) recomputed per
# grid step (hidden under the streamed-w3 DMA), then one
# (B, 500) @bf16 (500, tile_n) tile of the final Linear with f32 accumulation.
# -----------------------------------------------------------------------------
def decoder_kernel(x_ref,
                   bn1g_ref, bn1b_ref, w1_ref, b1_ref,
                   bn2g_ref, bn2b_ref, w2_ref, b2_ref,
                   bn3g_ref, bn3b_ref,
                   w3_ref, b3_ref,
                   o_ref):
    # --- front of the MLP (tiny; fully hidden under the w3 tile DMA) ---------
    h = _batchnorm_train(x_ref[...], bn1g_ref[...], bn1b_ref[...])   # (B, 2)
    # K=2 Linear as a VPU multiply-add (avoids a tiny-K MXU push).
    w1 = w1_ref[...]                                                  # (2, H1)
    h = h[:, 0:1] * w1[0:1, :] + h[:, 1:2] * w1[1:2, :] + b1_ref[...]
    h = jnp.maximum(h, 0.0)                                           # ReLU
    h = _batchnorm_train(h, bn2g_ref[...], bn2b_ref[...])
    h = jnp.dot(h, w2_ref[...], preferred_element_type=jnp.float32) + b2_ref[...]
    h = jnp.maximum(h, 0.0)                                           # ReLU
    h = _batchnorm_train(h, bn3g_ref[...], bn3b_ref[...])             # (B, 500) f32

    # --- streamed final Linear tile: bf16 operands, f32 accumulate -----------
    o_ref[...] = (jnp.dot(h.astype(jnp.bfloat16), w3_ref[...],
                          preferred_element_type=jnp.float32)
                  + b3_ref[...])


# -----------------------------------------------------------------------------
# One-time host-side parameter preparation (NOT per call): pad the output dim
# to a multiple of tile_n, cast w3 to bf16, and lay each streamed block out
# contiguously as (grid_n, H2, tile_n).
# -----------------------------------------------------------------------------
def prepare_params(p, tile_n=TILE_N):
    grid_n = pl.cdiv(N_OUT, tile_n)
    n_pad = grid_n * tile_n
    w3 = jnp.pad(p["w3"], ((0, 0), (0, n_pad - N_OUT)))               # (H2, n_pad)
    w3 = w3.reshape(H2, grid_n, tile_n).transpose(1, 0, 2)            # (grid_n, H2, tile_n)
    b3 = jnp.pad(p["b3"], ((0, 0), (0, n_pad - N_OUT)))               # (1, n_pad) f32
    kp = dict(p)
    kp["w3"] = w3.astype(jnp.bfloat16)
    kp["b3"] = b3
    return kp


@jax.jit
def decoder_forward(x, kp):
    B = x.shape[0]
    grid_n, _, tile_n = kp["w3"].shape
    n_pad = grid_n * tile_n

    def full(shape):
        # whole-array block, block index never changes -> DMA'd once
        return pl.BlockSpec(shape, lambda j: (0, 0))

    cost = pl.CostEstimate(
        flops=2 * B * (N_LATENT * H1 + H1 * H2 + H2 * n_pad),
        transcendentals=0,
        bytes_accessed=(2 * H2 * n_pad                       # bf16 w3 stream
                        + 4 * (n_pad + B * n_pad
                               + N_LATENT * H1 + H1 * H2 + B * N_LATENT)),
    )

    out = pl.pallas_call(
        decoder_kernel,
        out_shape=jax.ShapeDtypeStruct((B, n_pad), jnp.float32),
        grid=(grid_n,),
        in_specs=[
            full((B, N_LATENT)),                              # x
            full((1, N_LATENT)), full((1, N_LATENT)),         # bn1 gamma/beta
            full((N_LATENT, H1)), full((1, H1)),              # w1, b1
            full((1, H1)), full((1, H1)),                     # bn2 gamma/beta
            full((H1, H2)), full((1, H2)),                    # w2, b2
            full((1, H2)), full((1, H2)),                     # bn3 gamma/beta
            pl.BlockSpec((None, H2, tile_n), lambda j: (j, 0, 0)),  # w3 (contiguous stream)
            pl.BlockSpec((1, tile_n), lambda j: (0, j)),            # b3 (streamed)
        ],
        out_specs=pl.BlockSpec((B, tile_n), lambda j: (0, j)),
        compiler_params=pltpu.CompilerParams(
            dimension_semantics=("parallel",),
            vmem_limit_bytes=32 * 1024 * 1024),
        cost_estimate=cost,
    )(x,
      kp["bn1_g"], kp["bn1_b"], kp["w1"], kp["b1"],
      kp["bn2_g"], kp["bn2_b"], kp["w2"], kp["b2"],
      kp["bn3_g"], kp["bn3_b"],
      kp["w3"], kp["b3"])

    return out[:, :N_OUT]


# -----------------------------------------------------------------------------
# Pure-JAX reference (mirrors the PyTorch forward in training mode, all f32).
# -----------------------------------------------------------------------------
def decoder_reference(x, p):
    h = _batchnorm_train(x, p["bn1_g"], p["bn1_b"])
    h = h @ p["w1"] + p["b1"]
    h = jnp.maximum(h, 0.0)
    h = _batchnorm_train(h, p["bn2_g"], p["bn2_b"])
    h = h @ p["w2"] + p["b2"]
    h = jnp.maximum(h, 0.0)
    h = _batchnorm_train(h, p["bn3_g"], p["bn3_b"])
    return h @ p["w3"] + p["b3"]


def init_params(key):
    """Deterministic parameter init (nn.Linear-style uniform, BN gamma=1/beta=0)."""
    ks = jax.random.split(key, 6)

    def linear(kw, kb, fan_in, fan_out):
        bound = 1.0 / jnp.sqrt(float(fan_in))
        w = jax.random.uniform(kw, (fan_in, fan_out), jnp.float32, -bound, bound)
        b = jax.random.uniform(kb, (1, fan_out), jnp.float32, -bound, bound)
        return w, b

    w1, b1 = linear(ks[0], ks[1], N_LATENT, H1)
    w2, b2 = linear(ks[2], ks[3], H1, H2)
    w3, b3 = linear(ks[4], ks[5], H2, N_OUT)

    return {
        "bn1_g": jnp.ones((1, N_LATENT), jnp.float32),
        "bn1_b": jnp.zeros((1, N_LATENT), jnp.float32),
        "w1": w1, "b1": b1,
        "bn2_g": jnp.ones((1, H1), jnp.float32),
        "bn2_b": jnp.zeros((1, H1), jnp.float32),
        "w2": w2, "b2": b2,
        "bn3_g": jnp.ones((1, H2), jnp.float32),
        "bn3_b": jnp.zeros((1, H2), jnp.float32),
        "w3": w3, "b3": b3,
    }


if __name__ == "__main__":
    key = jax.random.PRNGKey(0)
    k_params, k_x = jax.random.split(key)

    params = init_params(k_params)                 # f32, PyTorch-equivalent
    kparams = prepare_params(params)               # one-time pad + bf16 + contiguous reshape

    batch = 8                                      # small batch; x has n_latent=2 features
    x = jax.random.normal(k_x, (batch, N_LATENT), dtype=jnp.float32)

    out = jax.block_until_ready(decoder_forward(x, kparams))

    # Full-f32 reference; tolerance loosened because the kernel streams w3 in
    # bfloat16 (f32 accumulation) per the bandwidth optimization.
    ref = decoder_reference(x, params)
    assert out.shape == (batch, N_OUT), out.shape
    max_err = float(jnp.max(jnp.abs(out - ref)))
    assert jnp.allclose(out, ref, rtol=3e-2, atol=3e-2), max_err

    print("KERNEL_OK")
</pallas_src>

<mosaic_0001>
module attributes {stable_mosaic.version = 11 : i64} {
  func.func @decoder_kernel(%arg0: i32, %arg1: memref<8x2xf32, #tpu.memory_space<vmem>>, %arg2: memref<1x2xf32, #tpu.memory_space<vmem>>, %arg3: memref<1x2xf32, #tpu.memory_space<vmem>>, %arg4: memref<2x100xf32, #tpu.memory_space<vmem>>, %arg5: memref<1x100xf32, #tpu.memory_space<vmem>>, %arg6: memref<1x100xf32, #tpu.memory_space<vmem>>, %arg7: memref<1x100xf32, #tpu.memory_space<vmem>>, %arg8: memref<100x500xf32, #tpu.memory_space<vmem>>, %arg9: memref<1x500xf32, #tpu.memory_space<vmem>>, %arg10: memref<1x500xf32, #tpu.memory_space<vmem>>, %arg11: memref<1x500xf32, #tpu.memory_space<vmem>>, %arg12: memref<1x500x1536xbf16, #tpu.memory_space<vmem>>, %arg13: memref<1x1536xf32, #tpu.memory_space<vmem>>, %arg14: memref<8x1536xf32, #tpu.memory_space<vmem>>) attributes {dimension_semantics = [#tpu.dimension_semantics<parallel>], iteration_bounds = array<i64: 4>, scalar_prefetch = 0 : i64, scratch_operands = 0 : i64, tpu.core_type = #tpu.core_type<tc>, window_params = [{pipeline_mode = #tpu.pipeline_mode<synchronous>, transform_indices = @transform_0, window_bounds = array<i64: 8, 2>}, {pipeline_mode = #tpu.pipeline_mode<synchronous>, transform_indices = @transform_1, window_bounds = array<i64: 1, 2>}, {pipeline_mode = #tpu.pipeline_mode<synchronous>, transform_indices = @transform_2, window_bounds = array<i64: 1, 2>}, {pipeline_mode = #tpu.pipeline_mode<synchronous>, transform_indices = @transform_3, window_bounds = array<i64: 2, 100>}, {pipeline_mode = #tpu.pipeline_mode<synchronous>, transform_indices = @transform_4, window_bounds = array<i64: 1, 100>}, {pipeline_mode = #tpu.pipeline_mode<synchronous>, transform_indices = @transform_5, window_bounds = array<i64: 1, 100>}, {pipeline_mode = #tpu.pipeline_mode<synchronous>, transform_indices = @transform_6, window_bounds = array<i64: 1, 100>}, {pipeline_mode = #tpu.pipeline_mode<synchronous>, transform_indices = @transform_7, window_bounds = array<i64: 100, 500>}, {pipeline_mode = #tpu.pipeline_mode<synchronous>, transform_indices = @transform_8, window_bounds = array<i64: 1, 500>}, {pipeline_mode = #tpu.pipeline_mode<synchronous>, transform_indices = @transform_9, window_bounds = array<i64: 1, 500>}, {pipeline_mode = #tpu.pipeline_mode<synchronous>, transform_indices = @transform_10, window_bounds = array<i64: 1, 500>}, {transform_indices = @transform_11, window_bounds = array<i64: 1, 500, 1536>}, {transform_indices = @transform_12, window_bounds = array<i64: 1, 1536>}, {transform_indices = @transform_13, window_bounds = array<i64: 8, 1536>}]} {
    %c0 = arith.constant 0 : index
    %c0_0 = arith.constant 0 : index
    %0 = vector.load %arg1[%c0, %c0_0] : memref<8x2xf32, #tpu.memory_space<vmem>>, vector<8x2xf32>
    %c0_1 = arith.constant 0 : index
    %c0_2 = arith.constant 0 : index
    %1 = vector.load %arg2[%c0_1, %c0_2] : memref<1x2xf32, #tpu.memory_space<vmem>>, vector<1x2xf32>
    %c0_3 = arith.constant 0 : index
    %c0_4 = arith.constant 0 : index
    %2 = vector.load %arg3[%c0_3, %c0_4] : memref<1x2xf32, #tpu.memory_space<vmem>>, vector<1x2xf32>
    %cst = arith.constant dense<0.000000e+00> : vector<2xf32>
    %3 = vector.multi_reduction <add>, %0, %cst [0] : vector<8x2xf32> to vector<2xf32>
    %4 = vector.shape_cast %3 : vector<2xf32> to vector<1x2xf32>
    %cst_5 = arith.constant 8.000000e+00 : f32
    %5 = vector.broadcast %cst_5 : f32 to vector<1x2xf32>
    %6 = arith.divf %4, %5 : vector<1x2xf32>
    %7 = vector.broadcast %6 : vector<1x2xf32> to vector<8x2xf32>
    %8 = arith.subf %0, %7 : vector<8x2xf32>
    %9 = arith.mulf %8, %8 : vector<8x2xf32>
    %cst_6 = arith.constant dense<0.000000e+00> : vector<2xf32>
    %10 = vector.multi_reduction <add>, %9, %cst_6 [0] : vector<8x2xf32> to vector<2xf32>
    %11 = vector.shape_cast %10 : vector<2xf32> to vector<1x2xf32>
    %cst_7 = arith.constant 8.000000e+00 : f32
    %12 = vector.broadcast %cst_7 : f32 to vector<1x2xf32>
    %13 = arith.divf %11, %12 : vector<1x2xf32>
    %14 = vector.broadcast %6 : vector<1x2xf32> to vector<8x2xf32>
    %15 = arith.subf %0, %14 : vector<8x2xf32>
    %cst_8 = arith.constant 9.99999974E-6 : f32
    %16 = vector.broadcast %cst_8 : f32 to vector<1x2xf32>
    %17 = arith.addf %13, %16 : vector<1x2xf32>
    %18 = math.rsqrt %17 : vector<1x2xf32>
    %19 = vector.broadcast %18 : vector<1x2xf32> to vector<8x2xf32>
    %20 = arith.mulf %15, %19 : vector<8x2xf32>
    %21 = vector.broadcast %1 : vector<1x2xf32> to vector<8x2xf32>
    %22 = arith.mulf %20, %21 : vector<8x2xf32>
    %23 = vector.broadcast %2 : vector<1x2xf32> to vector<8x2xf32>
    %24 = arith.addf %22, %23 : vector<8x2xf32>
    %c0_9 = arith.constant 0 : index
    %c0_10 = arith.constant 0 : index
    %25 = vector.load %arg4[%c0_9, %c0_10] : memref<2x100xf32, #tpu.memory_space<vmem>>, vector<2x100xf32>
    %26 = vector.extract_strided_slice %24 {offsets = [0, 0], sizes = [8, 1], strides = [1, 1]} : vector<8x2xf32> to vector<8x1xf32>
    %27 = vector.extract_strided_slice %25 {offsets = [0, 0], sizes = [1, 100], strides = [1, 1]} : vector<2x100xf32> to vector<1x100xf32>
    %28 = vector.broadcast %26 : vector<8x1xf32> to vector<8x100xf32>
    %29 = vector.broadcast %27 : vector<1x100xf32> to vector<8x100xf32>
    %30 = arith.mulf %28, %29 : vector<8x100xf32>
    %31 = vector.extract_strided_slice %24 {offsets = [0, 1], sizes = [8, 1], strides = [1, 1]} : vector<8x2xf32> to vector<8x1xf32>
    %32 = vector.extract_strided_slice %25 {offsets = [1, 0], sizes = [1, 100], strides = [1, 1]} : vector<2x100xf32> to vector<1x100xf32>
    %33 = vector.broadcast %31 : vector<8x1xf32> to vector<8x100xf32>
    %34 = vector.broadcast %32 : vector<1x100xf32> to vector<8x100xf32>
    %35 = arith.mulf %33, %34 : vector<8x100xf32>
    %36 = arith.addf %30, %35 : vector<8x100xf32>
    %c0_11 = arith.constant 0 : index
    %c0_12 = arith.constant 0 : index
    %37 = vector.load %arg5[%c0_11, %c0_12] : memref<1x100xf32, #tpu.memory_space<vmem>>, vector<1x100xf32>
    %38 = vector.broadcast %37 : vector<1x100xf32> to vector<8x100xf32>
    %39 = arith.addf %36, %38 : vector<8x100xf32>
    %cst_13 = arith.constant 0.000000e+00 : f32
    %40 = vector.broadcast %cst_13 : f32 to vector<8x100xf32>
    %41 = arith.maximumf %39, %40 : vector<8x100xf32>
    %c0_14 = arith.constant 0 : index
    %c0_15 = arith.constant 0 : index
    %42 = vector.load %arg6[%c0_14, %c0_15] : memref<1x100xf32, #tpu.memory_space<vmem>>, vector<1x100xf32>
    %c0_16 = arith.constant 0 : index
    %c0_17 = arith.constant 0 : index
    %43 = vector.load %arg7[%c0_16, %c0_17] : memref<1x100xf32, #tpu.memory_space<vmem>>, vector<1x100xf32>
    %cst_18 = arith.constant dense<0.000000e+00> : vector<100xf32>
    %44 = vector.multi_reduction <add>, %41, %cst_18 [0] : vector<8x100xf32> to vector<100xf32>
    %45 = vector.shape_cast %44 : vector<100xf32> to vector<1x100xf32>
    %cst_19 = arith.constant 8.000000e+00 : f32
    %46 = vector.broadcast %cst_19 : f32 to vector<1x100xf32>
    %47 = arith.divf %45, %46 : vector<1x100xf32>
    %48 = vector.broadcast %47 : vector<1x100xf32> to vector<8x100xf32>
    %49 = arith.subf %41, %48 : vector<8x100xf32>
    %50 = arith.mulf %49, %49 : vector<8x100xf32>
    %cst_20 = arith.constant dense<0.000000e+00> : vector<100xf32>
    %51 = vector.multi_reduction <add>, %50, %cst_20 [0] : vector<8x100xf32> to vector<100xf32>
    %52 = vector.shape_cast %51 : vector<100xf32> to vector<1x100xf32>
    %cst_21 = arith.constant 8.000000e+00 : f32
    %53 = vector.broadcast %cst_21 : f32 to vector<1x100xf32>
    %54 = arith.divf %52, %53 : vector<1x100xf32>
    %55 = vector.broadcast %47 : vector<1x100xf32> to vector<8x100xf32>
    %56 = arith.subf %41, %55 : vector<8x100xf32>
    %cst_22 = arith.constant 9.99999974E-6 : f32
    %57 = vector.broadcast %cst_22 : f32 to vector<1x100xf32>
    %58 = arith.addf %54, %57 : vector<1x100xf32>
    %59 = math.rsqrt %58 : vector<1x100xf32>
    %60 = vector.broadcast %59 : vector<1x100xf32> to vector<8x100xf32>
    %61 = arith.mulf %56, %60 : vector<8x100xf32>
    %62 = vector.broadcast %42 : vector<1x100xf32> to vector<8x100xf32>
    %63 = arith.mulf %61, %62 : vector<8x100xf32>
    %64 = vector.broadcast %43 : vector<1x100xf32> to vector<8x100xf32>
    %65 = arith.addf %63, %64 : vector<8x100xf32>
    %c0_23 = arith.constant 0 : index
    %c0_24 = arith.constant 0 : index
    %66 = vector.load %arg8[%c0_23, %c0_24] : memref<100x500xf32, #tpu.memory_space<vmem>>, vector<100x500xf32>
    %cst_25 = arith.constant dense<0.000000e+00> : vector<8x500xf32>
    %67 = tpu.matmul %65, %66, %cst_25 {dimension_numbers = #tpu.dot_dimension_numbers<[1], [0], [0], [1], [0, 0, 1, 1], [], []>} : vector<8x100xf32>, vector<100x500xf32>, vector<8x500xf32> -> vector<8x500xf32>
    %c0_26 = arith.constant 0 : index
    %c0_27 = arith.constant 0 : index
    %68 = vector.load %arg9[%c0_26, %c0_27] : memref<1x500xf32, #tpu.memory_space<vmem>>, vector<1x500xf32>
    %69 = vector.broadcast %68 : vector<1x500xf32> to vector<8x500xf32>
    %70 = arith.addf %67, %69 : vector<8x500xf32>
    %cst_28 = arith.constant 0.000000e+00 : f32
    %71 = vector.broadcast %cst_28 : f32 to vector<8x500xf32>
    %72 = arith.maximumf %70, %71 : vector<8x500xf32>
    %c0_29 = arith.constant 0 : index
    %c0_30 = arith.constant 0 : index
    %73 = vector.load %arg10[%c0_29, %c0_30] : memref<1x500xf32, #tpu.memory_space<vmem>>, vector<1x500xf32>
    %c0_31 = arith.constant 0 : index
    %c0_32 = arith.constant 0 : index
    %74 = vector.load %arg11[%c0_31, %c0_32] : memref<1x500xf32, #tpu.memory_space<vmem>>, vector<1x500xf32>
    %cst_33 = arith.constant dense<0.000000e+00> : vector<500xf32>
    %75 = vector.multi_reduction <add>, %72, %cst_33 [0] : vector<8x500xf32> to vector<500xf32>
    %76 = vector.shape_cast %75 : vector<500xf32> to vector<1x500xf32>
    %cst_34 = arith.constant 8.000000e+00 : f32
    %77 = vector.broadcast %cst_34 : f32 to vector<1x500xf32>
    %78 = arith.divf %76, %77 : vector<1x500xf32>
    %79 = vector.broadcast %78 : vector<1x500xf32> to vector<8x500xf32>
    %80 = arith.subf %72, %79 : vector<8x500xf32>
    %81 = arith.mulf %80, %80 : vector<8x500xf32>
    %cst_35 = arith.constant dense<0.000000e+00> : vector<500xf32>
    %82 = vector.multi_reduction <add>, %81, %cst_35 [0] : vector<8x500xf32> to vector<500xf32>
    %83 = vector.shape_cast %82 : vector<500xf32> to vector<1x500xf32>
    %cst_36 = arith.constant 8.000000e+00 : f32
    %84 = vector.broadcast %cst_36 : f32 to vector<1x500xf32>
    %85 = arith.divf %83, %84 : vector<1x500xf32>
    %86 = vector.broadcast %78 : vector<1x500xf32> to vector<8x500xf32>
    %87 = arith.subf %72, %86 : vector<8x500xf32>
    %cst_37 = arith.constant 9.99999974E-6 : f32
    %88 = vector.broadcast %cst_37 : f32 to vector<1x500xf32>
    %89 = arith.addf %85, %88 : vector<1x500xf32>
    %90 = math.rsqrt %89 : vector<1x500xf32>
    %91 = vector.broadcast %90 : vector<1x500xf32> to vector<8x500xf32>
    %92 = arith.mulf %87, %91 : vector<8x500xf32>
    %93 = vector.broadcast %73 : vector<1x500xf32> to vector<8x500xf32>
    %94 = arith.mulf %92, %93 : vector<8x500xf32>
    %95 = vector.broadcast %74 : vector<1x500xf32> to vector<8x500xf32>
    %96 = arith.addf %94, %95 : vector<8x500xf32>
    %97 = arith.truncf %96 : vector<8x500xf32> to vector<8x500xbf16>
    %c0_38 = arith.constant 0 : index
    %c0_39 = arith.constant 0 : index
    %c0_40 = arith.constant 0 : index
    %98 = vector.load %arg12[%c0_38, %c0_39, %c0_40] : memref<1x500x1536xbf16, #tpu.memory_space<vmem>>, vector<1x500x1536xbf16>
    %99 = vector.shape_cast %98 : vector<1x500x1536xbf16> to vector<500x1536xbf16>
    %cst_41 = arith.constant dense<0.000000e+00> : vector<8x1536xf32>
    %100 = tpu.matmul %97, %99, %cst_41 {dimension_numbers = #tpu.dot_dimension_numbers<[1], [0], [0], [1], [0, 0, 1, 1], [], []>} : vector<8x500xbf16>, vector<500x1536xbf16>, vector<8x1536xf32> -> vector<8x1536xf32>
    %c0_42 = arith.constant 0 : index
    %c0_43 = arith.constant 0 : index
    %101 = vector.load %arg13[%c0_42, %c0_43] : memref<1x1536xf32, #tpu.memory_space<vmem>>, vector<1x1536xf32>
    %102 = vector.broadcast %101 : vector<1x1536xf32> to vector<8x1536xf32>
    %103 = arith.addf %100, %102 : vector<8x1536xf32>
    %c0_44 = arith.constant 0 : index
    %c0_45 = arith.constant 0 : index
    %104 = vector.load %arg14[%c0_44, %c0_45] : memref<8x1536xf32, #tpu.memory_space<vmem>>, vector<8x1536xf32>
    tpu.vector_store %arg14[%c0_44, %c0_45], %103 {strides = array<i32>} : memref<8x1536xf32, #tpu.memory_space<vmem>>, vector<8x1536xf32>,
    return
  }
  func.func @transform_0(%arg0: i32) -> (i32, i32) {
    %c0_i32 = arith.constant 0 : i32
    %c0_i32_0 = arith.constant 0 : i32
    %c0_i32_1 = arith.constant 0 : i32
    return %c0_i32, %c0_i32_0 : i32, i32
  }
  func.func @transform_1(%arg0: i32) -> (i32, i32) {
    %c0_i32 = arith.constant 0 : i32
    %c0_i32_0 = arith.constant 0 : i32
    %c0_i32_1 = arith.constant 0 : i32
    return %c0_i32, %c0_i32_0 : i32, i32
  }
  func.func @transform_2(%arg0: i32) -> (i32, i32) {
    %c0_i32 = arith.constant 0 : i32
    %c0_i32_0 = arith.constant 0 : i32
    %c0_i32_1 = arith.constant 0 : i32
    return %c0_i32, %c0_i32_0 : i32, i32
  }
  func.func @transform_3(%arg0: i32) -> (i32, i32) {
    %c0_i32 = arith.constant 0 : i32
    %c0_i32_0 = arith.constant 0 : i32
    %c0_i32_1 = arith.constant 0 : i32
    return %c0_i32, %c0_i32_0 : i32, i32
  }
  func.func @transform_4(%arg0: i32) -> (i32, i32) {
    %c0_i32 = arith.constant 0 : i32
    %c0_i32_0 = arith.constant 0 : i32
    %c0_i32_1 = arith.constant 0 : i32
    return %c0_i32, %c0_i32_0 : i32, i32
  }
  func.func @transform_5(%arg0: i32) -> (i32, i32) {
    %c0_i32 = arith.constant 0 : i32
    %c0_i32_0 = arith.constant 0 : i32
    %c0_i32_1 = arith.constant 0 : i32
    return %c0_i32, %c0_i32_0 : i32, i32
  }
  func.func @transform_6(%arg0: i32) -> (i32, i32) {
    %c0_i32 = arith.constant 0 : i32
    %c0_i32_0 = arith.constant 0 : i32
    %c0_i32_1 = arith.constant 0 : i32
    return %c0_i32, %c0_i32_0 : i32, i32
  }
  func.func @transform_7(%arg0: i32) -> (i32, i32) {
    %c0_i32 = arith.constant 0 : i32
    %c0_i32_0 = arith.constant 0 : i32
    %c0_i32_1 = arith.constant 0 : i32
    return %c0_i32, %c0_i32_0 : i32, i32
  }
  func.func @transform_8(%arg0: i32) -> (i32, i32) {
    %c0_i32 = arith.constant 0 : i32
    %c0_i32_0 = arith.constant 0 : i32
    %c0_i32_1 = arith.constant 0 : i32
    return %c0_i32, %c0_i32_0 : i32, i32
  }
  func.func @transform_9(%arg0: i32) -> (i32, i32) {
    %c0_i32 = arith.constant 0 : i32
    %c0_i32_0 = arith.constant 0 : i32
    %c0_i32_1 = arith.constant 0 : i32
    return %c0_i32, %c0_i32_0 : i32, i32
  }
  func.func @transform_10(%arg0: i32) -> (i32, i32) {
    %c0_i32 = arith.constant 0 : i32
    %c0_i32_0 = arith.constant 0 : i32
    %c0_i32_1 = arith.constant 0 : i32
    return %c0_i32, %c0_i32_0 : i32, i32
  }
  func.func @transform_11(%arg0: i32) -> (i32, i32, i32) {
    %c0_i32 = arith.constant 0 : i32
    %c0_i32_0 = arith.constant 0 : i32
    %c0_i32_1 = arith.constant 0 : i32
    return %arg0, %c0_i32, %c0_i32_0 : i32, i32, i32
  }
  func.func @transform_12(%arg0: i32) -> (i32, i32) {
    %c0_i32 = arith.constant 0 : i32
    %c0_i32_0 = arith.constant 0 : i32
    return %c0_i32, %arg0 : i32, i32
  }
  func.func @transform_13(%arg0: i32) -> (i32, i32) {
    %c0_i32 = arith.constant 0 : i32
    %c0_i32_0 = arith.constant 0 : i32
    return %c0_i32, %arg0 : i32, i32
  }
}

</mosaic_0001>

<bundles_post_ra>
// kernel: decoder_forward.1
= control target key start
LH: loop header
LB: loop body
LE: loop exit
PB: predicated region body
PF: predicated region fallthrough
CT: control target
= control target key end

     0   :  { %s5966_s0 = inlined_call_operand.vmem [shape: f32[8,2], index: 0, kind: input, shape index: {}]   ;;  %s5967_s1 = inlined_call_operand.vmem [shape: f32[1,2], index: 1, kind: input, shape index: {}]   ;;  %s5968_s2 = inlined_call_operand.vmem [shape: f32[1,2], index: 2, kind: input, shape index: {}]   ;;  %s5969_s3 = inlined_call_operand.vmem [shape: f32[2,100], index: 3, kind: input, shape index: {}]   ;;  %s5970_s4 = inlined_call_operand.vmem [shape: f32[1,100], index: 4, kind: input, shape index: {}]   ;;  %s5971_s5 = inlined_call_operand.vmem [shape: f32[1,100], index: 5, kind: input, shape index: {}]   ;;  %s5972_s6 = inlined_call_operand.vmem [shape: f32[1,100], index: 6, kind: input, shape index: {}]   ;;  %s5973_s7 = inlined_call_operand.vmem [shape: f32[100,500], index: 7, kind: input, shape index: {}]   ;;  %s5974_s8 = inlined_call_operand.vmem [shape: f32[1,500], index: 8, kind: input, shape index: {}]   ;;  %s5975_s9 = inlined_call_operand.vmem [shape: f32[1,500], index: 9, kind: input, shape index: {}]   ;;  %s5976_s10 = inlined_call_operand.vmem [shape: f32[1,500], index: 10, kind: input, shape index: {}]   ;;  %s5977_s11 = inlined_call_operand.vmem [shape: bf16[4,500,1536], index: 11, kind: input, shape index: {}]   ;;  %s5978_s12 = inlined_call_operand.vmem [shape: f32[1,6144], index: 12, kind: input, shape index: {}]   ;;  %s5979_s13 = inlined_call_operand.hbm [shape: f32[8,6144], index: 13, kind: output, shape index: {}]  }
   0x1   :  { %5980 = sst [smem:[#allocation6_spill]] %s5966_s0 }
   0x2   :  { %5981 = sst [smem:[#allocation7_spill]] %s5967_s1 }
   0x3   :  { %5982 = sst [smem:[#allocation8_spill]] %s5968_s2 }
   0x4   :  { %18 = vsyncpa [#allocation3], 0 }
   0x5   :  { %20 = vsyncpa [#allocation3 + $0x1], 0  ;;  %s5163_s25 = smov 0   ;;  %s5165_s26 = smov 0  }
   0x6   :  { %s5167_s27 = smov 0   ;;  %s5169_s28 = smov 0  }
   0x7 LB: > { %s5184_s29 = sadd.s32 4294967295, %s5087_s28   ;;  %s3897_s30 = sadd.s32 4294967294, %s5087_s28   ;;  %s5087_s28 = sphi %s5169_s28, %s5993_s28   ;;  %s5083_s27 = sphi %s5167_s27, %s5992_s27   ;;  %s5079_s26 = sphi %s5165_s26, %s5991_s26   ;;  %s5075_s25 = sphi %s5163_s25, %s5990_s25  }
   0x8   : > { %s5188_s14 = sadd.s32 1, %s5087_s28   ;;  %s316_s15 = sadd.s32 1, %s5083_s27 }
   0x9   : > { %s313_s16 = ssub.s32 %s5087_s28, %s5188_s14  ;;  %p326_p0 = scmp.ne.s32.totalorder %s5083_s27, %s5079_s26 }
   0xa   : > { %p314_p1 = scmp.eq.s32.totalorder %s313_s16, 0  ;;  %p327_p2 = scmp.eq.s32.totalorder %s5184_s29, 3 }
   0xb   : > { %p332_p3 = scmp.ne.s32.totalorder %s5079_s26, %s5075_s25  ;;  %p333_p4 = scmp.eq.s32.totalorder %s3897_s30, 3 }
   0xc   : > { %s5199_s17 = scalar_select %p314_p1, %s5083_s27, %s316_s15  }
   0xd   : > { %p5201_p5 = por %p327_p2, %p326_p0  ;;  %p5205_p6 = por %p333_p4, %p332_p3 }
   0xe   : > { %5983 = sst [smem:[#allocation5_spill]] %s5199_s17  ;;  %p3900_p7 = scmp.ge.s32.totalorder %s5087_s28, 1 }
   0xf   : > { %p400_p8 = scmp.lt.s32.totalorder %s5087_s28, 5 }
  0x11   : > { %p401_p9 = pnand %p3900_p7, %p400_p8 }
  0x12   : > { %s5986_s0 = sld [smem:[#allocation6_spill]] (!%p401_p9)  ;;  %v5089_v1 = vmov (!%p401_p9), 0   ;;  %vm462_vm0 = vcmask (!%p401_p9), 15360   ;;  %s5987_s1 = sld [smem:[#allocation7_spill]] (!%p401_p9)  ;;  %v5090_v27 = vmov (!%p401_p9), 1   ;;  %v568_v28 = vld [vmem:[%s5973_s7 + $0x8] sm:$0xff] (!%p401_p9) }
  0x13   : > { %404 = sbr.rel (%p401_p9) target bundleno = 1094 (0x446), region = 72  ;;  %4441 = vset.pattern.permute.xlu0 (!%p401_p9), %v5089_v1  ;;  %s5988_s2 = sld [smem:[#allocation8_spill]] (!%p401_p9)  ;;  %v572_v29 = vld [vmem:[%s5973_s7 + $0x28] sm:$0xff] (!%p401_p9)  ;;  %v570_v30 = vld [vmem:[%s5973_s7 + $0x18] sm:$0xff] (!%p401_p9)  ;;  %v567_v33 = vld [vmem:[%s5973_s7] sm:$0xff] (!%p401_p9)  ;;  %v5091_v35 = vmov (!%p401_p9), 0.0  }
  0x14   : > { %v4313_v31 = vpack.c.bf16 (!%p401_p9), %v572_v29, %v568_v28  ;;  %v574_v32 = vld [vmem:[%s5973_s7 + $0x38] sm:$0xff] (!%p401_p9)  ;;  %v571_v34 = vld [vmem:[%s5973_s7 + $0x20] sm:$0xff] (!%p401_p9)  ;;  %721 = vmatprep.mubr.f32.mxu0 (!%p401_p9), %v5091_v35  ;;  %792 = vmatprep.mubr.f32.mxu1 (!%p401_p9), %v5091_v35  ;;  %v569_v38 = vld [vmem:[%s5973_s7 + $0x10] sm:$0xff] (!%p401_p9)  ;;  %vm644_vm1 = vcmask (!%p401_p9), 1043456   ;;  %p448_p10 = scmp.lt.s32.totalorder (!%p401_p9), %s5184_s29, 3  ;;  %vm531_vm2 = vcmask (!%p401_p9), 818176  }
  0x15   : > { %v4337_v36 = vpack.c.bf16 (!%p401_p9), %v574_v32, %v570_v30  ;;  %v4315_v37 = vpack.c.bf16 (!%p401_p9), %v571_v34, %v567_v33  ;;  %v573_v39 = vld [vmem:[%s5973_s7 + $0x30] sm:$0xff] (!%p401_p9)  ;;  %v576_v40 = vld [vmem:[%s5973_s7 + $0x48] sm:$0xff] (!%p401_p9)  ;;  %v578_v43 = vld [vmem:[%s5973_s7 + $0x58] sm:$0xff] (!%p401_p9)  ;;  %vm823_vm3 = vcmask (!%p401_p9), 949248   ;;  %vm3273_vm4 = vcmask (!%p401_p9), 1041408   ;;  %s453_s24 = smul.u32 (!%p401_p9), 12, %s5184_s29 }
  0x16   : > { %4314 = vmatprep.subr.bf16.mxu0 (!%p401_p9), %v4313_v31  ;;  %v4339_v41 = vpack.c.bf16 (!%p401_p9), %v573_v39, %v569_v38  ;;  %v580_v42 = vld [vmem:[%s5973_s7 + $0x68] sm:$0xff] (!%p401_p9)  ;;  %v582_v44 = vld [vmem:[%s5973_s7 + $0x78] sm:$0xff] (!%p401_p9)  ;;  %v575_v47 = vld [vmem:[%s5973_s7 + $0x40] sm:$0xff] (!%p401_p9)  ;;  %s5092_s30 = smov (!%p401_p9), [#allocation2]  }
  0x17   : > { %4338 = vmatprep.subr.bf16.mxu1 (!%p401_p9), %v4337_v36  ;;  %4316 = vmatpush1.bf16.msra.mxu0 (!%p401_p9), %v4315_v37  ;;  %v4317_v45 = vpack.c.bf16 (!%p401_p9), %v580_v42, %v576_v40  ;;  %v4341_v46 = vpack.c.bf16 (!%p401_p9), %v582_v44, %v578_v43  ;;  %v579_v48 = vld [vmem:[%s5973_s7 + $0x60] sm:$0xff] (!%p401_p9)  ;;  %v577_v49 = vld [vmem:[%s5973_s7 + $0x50] sm:$0xff] (!%p401_p9)  ;;  %v584_v52 = vld [vmem:[%s5973_s7 + $0x88] sm:$0xff] (!%p401_p9)  ;;  %v505_v43 = vlaneseq (!%p401_p9)  ;;  %p454_p11 = scmp.lt.s32.totalorder (!%p401_p9), %s453_s24, 47  ;;  %s5029_s17 = sshll.u32 (!%p401_p9), %s5092_s30, 4  ;;  %s5030_s17 = int_to_ptr.vmem [resolvable:$false] %s5029_s17 }
  0x18   : > { %v459_v0 = vld [vmem:[%s5986_s0] sm:$0xff] (!%p401_p9)  ;;  %4340 = vmatpush1.bf16.msra.mxu1 (!%p401_p9), %v4339_v41  ;;  %v4319_v50 = vpack.c.bf16 (!%p401_p9), %v579_v48, %v575_v47  ;;  %v581_v51 = vld [vmem:[%s5973_s7 + $0x70] sm:$0xff] (!%p401_p9)  ;;  %v588_v53 = vld [vmem:[%s5973_s7 + $0xa8] sm:$0xff] (!%p401_p9) }
  0x19   : > { %v463_v2 = vsel (!%p401_p9), %vm462_vm0, %v459_v0, 0.0  ;;  %v3902_v22 = vld [vmem:[%s5987_s1] ss:$0 sm:$0xff] (!%p401_p9)  ;;  %4318 = vmatprep.subr.bf16.mxu0 (!%p401_p9), %v4317_v45  ;;  %4342 = vmatprep.subr.bf16.mxu1 (!%p401_p9), %v4341_v46  ;;  %v4343_v54 = vpack.c.bf16 (!%p401_p9), %v581_v51, %v577_v49  ;;  %v4321_v55 = vpack.c.bf16 (!%p401_p9), %v588_v53, %v584_v52  ;;  %v586_v56 = vld [vmem:[%s5973_s7 + $0x98] sm:$0xff] (!%p401_p9)  ;;  %v585_v61 = vld [vmem:[%s5973_s7 + $0x90] sm:$0xff] (!%p401_p9)  ;;  %v5385_v44 = vshrl.u32 (!%p401_p9), %v505_v43, 7 }
  0x1a   : > { %v464_v3 = vrot.slane %v463_v2, 4  ;;  %v3903_v24 = vld [vmem:[%s5988_s2] ss:$0 sm:$0xff]  ;;  %v590_v57 = vld [vmem:[%s5973_s7 + $0xb8] sm:$0xff]  ;;  %v589_v62 = vld [vmem:[%s5973_s7 + $0xb0] sm:$0xff]  ;;  %s449_s16 = scalar_select %p448_p10, %s5184_s29, 3 }
  0x1b   : > { %v583_v58 = vld [vmem:[%s5973_s7 + $0x80] sm:$0xff]  ;;  %v4345_v59 = vpack.c.bf16 %v590_v57, %v586_v56  ;;  %4320 = vmatpush1.bf16.msra.mxu0 %v4319_v50  ;;  %v596_v1 = vld [vmem:[%s5973_s7 + $0xe8] sm:$0xff]  ;;  %v609_v33 = vld [vmem:[%s5973_s7 + $0x150] sm:$0xff]  ;;  %v5391_v46 = vsub.s32 0, %v5385_v44  ;;  %v5394_v47 = vsub.s32 1, %v5385_v44  ;;  %s5995_s24 = smov (!%p454_p11, %s453_s24), 47 }
  0x1c   : > { %v465_v4 = vadd.f32 %v464_v3, %v463_v2  ;;  %v587_v60 = vld [vmem:[%s5973_s7 + $0xa0] sm:$0xff]  ;;  %v594_v2 = vld [vmem:[%s5973_s7 + $0xd8] sm:$0xff]  ;;  %4344 = vmatpush1.bf16.msra.mxu1 %v4343_v54  ;;  %4322 = vmatprep.subr.bf16.mxu0 %v4321_v55  ;;  %v4347_v3 = vpack.c.bf16 %v589_v62, %v585_v61  ;;  %v613_v34 = vld [vmem:[%s5973_s7 + $0x170] sm:$0xff]  ;;  %s4398_s20 = smul.u32 3024, %s449_s16  ;;  %s5823_s15 = scalar_lea.vmem %s5978_s12, %s5995_s24 }
  0x1d   : > { %v4323_v63 = vpack.c.bf16 %v587_v60, %v583_v58  ;;  %4346 = vmatprep.subr.bf16.mxu1 %v4345_v59  ;;  %v607_v30 = vld [vmem:[%s5973_s7 + $0x140] sm:$0xff]  ;;  %v4359_v36 = vpack.c.bf16 %v613_v34, %v609_v33  ;;  %v616_v37 = vld [vmem:[%s5973_s7 + $0x188] sm:$0xf]  ;;  %v618_v38 = vld [vmem:[%s5973_s7 + $0x198] sm:$0xf]  ;;  %s445_s16 = sand.u32 1, %s5079_s26  }
  0x1e   : > { %v466_v5 = vrot.slane %v465_v4, 2  ;;  %v611_v31 = vld [vmem:[%s5973_s7 + $0x160] sm:$0xff]  ;;  %v617_v40 = vld [vmem:[%s5973_s7 + $0x190] sm:$0xf]  ;;  %s5381_s23 = scalar_lea.vmem %s5977_s11, %s4398_s20  ;;  %s4397_s20 = smul.u32 96, %s445_s16 }
  0x1f   : > { %4324 = vmatpush1.bf16.msra.mxu0 %v4323_v63  ;;  %v4335_v35 = vpack.c.bf16 %v611_v31, %v607_v30  ;;  %v615_v39 = vld [vmem:[%s5973_s7 + $0x180] sm:$0xf]  ;;  %v4445_v41 = vld [vmem:[%s5381_s23 + $0x4] ss:$48 sps:$4 sm:$0xff]   ;;  %v4448_v42 = vld [vmem:[%s5381_s23 + $0xc] ss:$48 sps:$4 sm:$0xff]  }
  0x20   : > { %v467_v6 = vadd.f32 %v466_v5, %v465_v4  ;;  %v598_v5 = vld [vmem:[%s5973_s7 + $0xf8] sm:$0xff]  ;;  %4348 = vmatpush1.bf16.msra.mxu1 %v4347_v3  ;;  %v499_v45 = vld [vmem:[%s5969_s3] sm:$0x3]  ;;  %v4469_v33 = vld [vmem:[%s5381_s23 + $0x184] ss:$48 sps:$4 sm:$0xff]   ;;  %s5849_s21 = scalar_lea.vmem [#allocation2], %s4397_s20 }
  0x21   : > { %v508_v49 = vrot.slane %v499_v45, %v5391_v46  ;;  %v517_v50 = vrot.slane %v499_v45, %v5394_v47  ;;  %v3904_v51 = vld [vmem:[%s5970_s4] ss:$0 sm:$0xff]  ;;  %v4466_v30 = vld [vmem:[%s5381_s23 + $0x12c] ss:$48 sps:$4 sm:$0xff]   ;;  %v4482_v45 = vld [vmem:[%s5381_s23 + $0x248] ss:$48 sps:$4 sm:$0xff]  }
  0x22   : > { %v468_v7 = vrot.slane %v467_v6, 1  ;;  %v4461_v31 = vld [vmem:[%s5381_s23 + $0x120] ss:$48 sps:$4 sm:$0xff]   ;;  %v4472_v34 = vld [vmem:[%s5381_s23 + $0x18c] ss:$48 sps:$4 sm:$0xff]   ;;  %s3829_s22 = sshll.u32 %s5849_s21, 4  ;;  %s5921_s22 = int_to_ptr.vmem [resolvable:$true] %s3829_s22 }
  0x23   : > { %v4479_v43 = vld [vmem:[%s5381_s23 + $0x240] ss:$48 sps:$4 sm:$0xff]   ;;  %s3815_s2 = scalar_lea.sflag [#allocation3], %s445_s16  ;;  %s5025_s24 = scalar_lea.vmem %s5921_s22, 1536 }
  0x24   : > { %v469_v8 = vadd.f32 %v468_v7, %v467_v6  ;;  %v591_v6 = vld [vmem:[%s5973_s7 + $0xc0] sm:$0xff]  ;;  %p5026_p12 = scmp.ne.s32.totalorder %s5921_s22, %s5025_s24  ;;  %p5032_p1 = scmp.lt.s32.totalorder %s5921_s22, %s5030_s17 }
  0x25   : > { %v595_v7 = vld [vmem:[%s5973_s7 + $0xe0] sm:$0xff] }
  0x26   : > { %v471_v9 = vmul.f32 0.125, %v469_v8  ;;  %v4349_v8 = vpack.c.bf16 %v598_v5, %v594_v2  ;;  %p5027_p13 = pnand %p5026_p12, %p5201_p5 }
  0x28   : > { %v472_v10 = vsub.f32 %v459_v0, %v471_v9  ;;  %v592_v0 = vld [vmem:[%s5973_s7 + $0xc8] sm:$0xff]  ;;  %v593_v9 = vld [vmem:[%s5973_s7 + $0xd0] sm:$0xff]  ;;  %4350 = vmatprep.subr.bf16.mxu1 %v4349_v8  ;;  %p5028_p0 = pneg %p5027_p13 }
  0x29   : > { %v4325_v4 = vpack.c.bf16 %v596_v1, %v592_v0 }
  0x2a   : > { %v473_v11 = vmul.f32 %v472_v10, %v472_v10 }
  0x2b   : > { %4326 = vmatprep.subr.bf16.mxu0 %v4325_v4 }
  0x2c   : > { %v474_v12 = vsel %vm462_vm0, %v473_v11, 0.0  ;;  %v600_v11 = vld [vmem:[%s5973_s7 + $0x108] sm:$0xff] }
  0x2d   : > { %v475_v13 = vrot.slane %v474_v12, 4 }
  0x2f   : > { %v476_v14 = vadd.f32 %v475_v13, %v474_v12  ;;  %v604_v12 = vld [vmem:[%s5973_s7 + $0x128] sm:$0xff]  ;;  %v602_v13 = vld [vmem:[%s5973_s7 + $0x118] sm:$0xff] }
  0x31   : > { %v477_v15 = vrot.slane %v476_v14, 2 }
  0x33   : > { %v478_v16 = vadd.f32 %v477_v15, %v476_v14  ;;  %v606_v14 = vld [vmem:[%s5973_s7 + $0x138] sm:$0xff]  ;;  %v4327_v15 = vpack.c.bf16 %v595_v7, %v591_v6 }
  0x35   : > { %v479_v17 = vrot.slane %v478_v16, 1  ;;  %4328 = vmatpush1.bf16.msra.mxu0 %v4327_v15  ;;  %v3906_v15 = vld [vmem:[%s5972_s6] ss:$0 sm:$0xff] }
  0x37   : > { %v480_v18 = vadd.f32 %v479_v17, %v478_v16  ;;  %v4329_v17 = vpack.c.bf16 %v604_v12, %v600_v11 }
  0x39   : > { %v481_v19 = vmul.f32 0.125, %v480_v18  ;;  %v599_v18 = vld [vmem:[%s5973_s7 + $0x100] sm:$0xff]  ;;  %4330 = vmatprep.subr.bf16.mxu0 %v4329_v17 }
  0x3a   : > { %v4443_v17 = vld [vmem:[%s5381_s23] ss:$48 sps:$4 sm:$0xff]  }
  0x3b   : > { %v482_v20 = vadd.f32 1e-05, %v481_v19  ;;  %v603_v19 = vld [vmem:[%s5973_s7 + $0x120] sm:$0xff] }
  0x3d   : > { %5013 = vrsqrt.f32 %v482_v20  ;;  %v601_v20 = vld [vmem:[%s5973_s7 + $0x110] sm:$0xff] }
  0x47   : > { %v5014_v21 = vpop.eup %5013 }
  0x48   : > { %v484_v23 = vmul.f32 %v5014_v21, %v472_v10  ;;  %v597_v10 = vld [vmem:[%s5973_s7 + $0xf0] sm:$0xff]  ;;  %v4353_v21 = vpack.c.bf16 %v606_v14, %v602_v13  ;;  %v3905_v13 = vld [vmem:[%s5971_s5] ss:$0 sm:$0xff] }
  0x49   : > { %v4351_v16 = vpack.c.bf16 %v597_v10, %v593_v9 }
  0x4a   : > { %v491_v25 = vmul.f32 %v3902_v22, %v484_v23  ;;  %v605_v22 = vld [vmem:[%s5973_s7 + $0x130] sm:$0xff]  ;;  %v608_v23 = vld [vmem:[%s5973_s7 + $0x148] sm:$0xff] }
  0x4b   : > { %4352 = vmatpush1.bf16.msra.mxu1 %v4351_v16  ;;  %v4355_v28 = vpack.c.bf16 %v605_v22, %v601_v20  ;;  %v4451_v20 = vld [vmem:[%s5381_s23 + $0x64] ss:$48 sps:$4 sm:$0xff]  }
  0x4c   : > { %v498_v26 = vadd.f32 %v3903_v24, %v491_v25  ;;  %v612_v24 = vld [vmem:[%s5973_s7 + $0x168] sm:$0xff]  ;;  %v610_v25 = vld [vmem:[%s5973_s7 + $0x158] sm:$0xff]  ;;  %4354 = vmatprep.subr.bf16.mxu1 %v4353_v21 }
  0x4d   : > { %v4333_v29 = vpack.c.bf16 %v612_v24, %v608_v23  ;;  %v4454_v21 = vld [vmem:[%s5381_s23 + $0x6c] ss:$48 sps:$4 sm:$0xff]   ;;  %v4449_v23 = vld [vmem:[%s5381_s23 + $0x60] ss:$48 sps:$4 sm:$0xff]   ;;  %v4452_v24 = vld [vmem:[%s5381_s23 + $0x68] ss:$48 sps:$4 sm:$0xff]  }
  0x4e   : > { %502 = vperm.xlu0 %4441, %v498_v26  }
  0x4f   : > { %4356 = vmatpush1.bf16.msra.mxu1 %v4355_v28  ;;  %v4458_v28 = vld [vmem:[%s5381_s23 + $0xc8] ss:$48 sps:$4 sm:$0xff]  }
  0x52   : > { %4442 = vset.pattern.permute.xlu0 %v5090_v27  ;;  %v4331_v27 = vpack.c.bf16 %v603_v19, %v599_v18  ;;  %v4446_v18 = vld [vmem:[%s5381_s23 + $0x8] ss:$48 sps:$4 sm:$0xff]  }
  0x53   : > { %511 = vperm.xlu0 %4442, %v498_v26   ;;  %v614_v26 = vld [vmem:[%s5973_s7 + $0x178] sm:$0xff] }
  0x54   : > { %v4357_v32 = vpack.c.bf16 %v614_v26, %v610_v25  ;;  %4332 = vmatpush1.bf16.msra.mxu0 %v4331_v27  ;;  %v4457_v25 = vld [vmem:[%s5381_s23 + $0xc4] ss:$48 sps:$4 sm:$0xff]   ;;  %v4460_v26 = vld [vmem:[%s5381_s23 + $0xcc] ss:$48 sps:$4 sm:$0xff]   ;;  %v4455_v27 = vld [vmem:[%s5381_s23 + $0xc0] ss:$48 sps:$4 sm:$0xff]  }
  0x55   : > { %4334 = vmatprep.subr.bf16.mxu0 %v4333_v29  ;;  %v4463_v29 = vld [vmem:[%s5381_s23 + $0x124] ss:$48 sps:$4 sm:$0xff]  }
  0x56   : > { %4358 = vmatprep.subr.bf16.mxu1 %v4357_v32  ;;  %v4464_v32 = vld [vmem:[%s5381_s23 + $0x128] ss:$48 sps:$4 sm:$0xff]  }
  0x57   : > { %4360 = vmatpush1.bf16.msra.mxu1 %v4359_v36  ;;  %v4470_v36 = vld [vmem:[%s5381_s23 + $0x188] ss:$48 sps:$4 sm:$0xff]  }
  0x58   : > { %4336 = vmatpush1.bf16.msra.mxu0 %v4335_v35  ;;  %3910 = vmatprep.subr.msk.mxu1 %vm644_vm1, %v618_v38  ;;  %v4467_v35 = vld [vmem:[%s5381_s23 + $0x180] ss:$48 sps:$4 sm:$0xff]   ;;  %v4478_v38 = vld [vmem:[%s5381_s23 + $0x1ec] ss:$48 sps:$4 sm:$0xff]  }
  0x59   : > { %3907 = vmatprep.subr.msk.mxu0 %vm644_vm1, %v616_v37  ;;  %v4475_v37 = vld [vmem:[%s5381_s23 + $0x1e4] ss:$48 sps:$4 sm:$0xff]  }
  0x5b   : > { %3911 = vmatpush1.msk.msra.mxu1 %vm644_vm1, %v617_v40  ;;  %v4476_v40 = vld [vmem:[%s5381_s23 + $0x1e8] ss:$48 sps:$4 sm:$0xff]  }
  0x5c   : > { %3908 = vmatpush1.msk.msra.mxu0 %vm644_vm1, %v615_v39  ;;  %3392 = vmatprep.subr.bf16.mxu1 %v4448_v42  ;;  %v4473_v39 = vld [vmem:[%s5381_s23 + $0x1e0] ss:$48 sps:$4 sm:$0xff]   ;;  %v4484_v42 = vld [vmem:[%s5381_s23 + $0x24c] ss:$48 sps:$4 sm:$0xff]  }
  0x5d   : > { %3310 = vmatprep.subr.bf16.mxu0 %v4445_v41  ;;  %v4481_v41 = vld [vmem:[%s5381_s23 + $0x244] ss:$48 sps:$4 sm:$0xff]  }
  0xcd   : > { %v503_v48 = vpop.permute.xlu0 %502 }
  0xce   : > { %v509_v53 = vmul.f32 %v508_v49, %v503_v48  ;;  %v4487_v48 = vld [vmem:[%s5381_s23 + $0x2a4] ss:$48 sps:$4 sm:$0xff]   ;;  %v4490_v49 = vld [vmem:[%s5381_s23 + $0x2ac] ss:$48 sps:$4 sm:$0xff]  }
  0xd2   : > { %v512_v52 = vpop.permute.xlu0 %511 }
  0xd3   : > { %v518_v54 = vmul.f32 %v517_v50, %v512_v52  ;;  %v4485_v50 = vld [vmem:[%s5381_s23 + $0x2a0] ss:$48 sps:$4 sm:$0xff]   ;;  %v4493_v52 = vld [vmem:[%s5381_s23 + $0x304] ss:$48 sps:$4 sm:$0xff]  }
  0xd5   : > { %v519_v55 = vadd.f32 %v518_v54, %v509_v53  ;;  %v4496_v53 = vld [vmem:[%s5381_s23 + $0x30c] ss:$48 sps:$4 sm:$0xff]   ;;  %v4491_v54 = vld [vmem:[%s5381_s23 + $0x300] ss:$48 sps:$4 sm:$0xff]  }
  0xd7   : > { %v527_v56 = vadd.f32 %v3904_v51, %v519_v55  ;;  %v4488_v51 = vld [vmem:[%s5381_s23 + $0x2a8] ss:$48 sps:$4 sm:$0xff]  }
  0xd8   : > { %v4494_v55 = vld [vmem:[%s5381_s23 + $0x308] ss:$48 sps:$4 sm:$0xff]  }
  0xd9   : > { %v528_v57 = vmax.f32 %v527_v56, 0.0  ;;  %v4499_v56 = vld [vmem:[%s5381_s23 + $0x364] ss:$48 sps:$4 sm:$0xff]  }
  0xdb   : > { %v532_v58 = vsel %vm531_vm2, %v528_v57, 0.0 }
  0xdc   : > { %v533_v59 = vrot.slane %v532_v58, 4 }
  0xde   : > { %v534_v60 = vadd.f32 %v533_v59, %v532_v58  ;;  %v4497_v58 = vld [vmem:[%s5381_s23 + $0x360] ss:$48 sps:$4 sm:$0xff]   ;;  %v4500_v59 = vld [vmem:[%s5381_s23 + $0x368] ss:$48 sps:$4 sm:$0xff]  }
  0xe0   : > { %v535_v61 = vrot.slane %v534_v60, 2 }
  0xe2   : > { %v536_v62 = vadd.f32 %v535_v61, %v534_v60  ;;  %v4505_v60 = vld [vmem:[%s5381_s23 + $0x3c4] ss:$48 sps:$4 sm:$0xff]   ;;  %v4508_v61 = vld [vmem:[%s5381_s23 + $0x3cc] ss:$48 sps:$4 sm:$0xff]  }
  0xe4   : > { %v537_v63 = vrot.slane %v536_v62, 1 }
  0xe6   : > { %v538_v0 = vadd.f32 %v537_v63, %v536_v62  ;;  %v4503_v62 = vld [vmem:[%s5381_s23 + $0x3c0] ss:$48 sps:$4 sm:$0xff]   ;;  %v4506_v63 = vld [vmem:[%s5381_s23 + $0x3c8] ss:$48 sps:$4 sm:$0xff]  }
  0xe8   : > { %v539_v1 = vmul.f32 0.125, %v538_v0  ;;  %v4511_v0 = vld [vmem:[%s5381_s23 + $0x424] ss:$48 sps:$4 sm:$0xff]  }
  0xea   : > { %v540_v2 = vsub.f32 %v528_v57, %v539_v1  ;;  %v4502_v57 = vld [vmem:[%s5381_s23 + $0x36c] ss:$48 sps:$4 sm:$0xff]  }
  0xeb   : > { %v4514_v1 = vld [vmem:[%s5381_s23 + $0x42c] ss:$48 sps:$4 sm:$0xff]  }
  0xec   : > { %v541_v3 = vmul.f32 %v540_v2, %v540_v2 }
  0xee   : > { %v542_v4 = vsel %vm531_vm2, %v541_v3, 0.0  ;;  %v4512_v3 = vld [vmem:[%s5381_s23 + $0x428] ss:$48 sps:$4 sm:$0xff]  }
  0xef   : > { %v543_v5 = vrot.slane %v542_v4, 4 }
  0xf1   : > { %v544_v6 = vadd.f32 %v543_v5, %v542_v4  ;;  %v4517_v4 = vld [vmem:[%s5381_s23 + $0x484] ss:$48 sps:$4 sm:$0xff]   ;;  %v4520_v5 = vld [vmem:[%s5381_s23 + $0x48c] ss:$48 sps:$4 sm:$0xff]  }
  0xf3   : > { %v545_v7 = vrot.slane %v544_v6, 2 }
  0xf5   : > { %v546_v8 = vadd.f32 %v545_v7, %v544_v6  ;;  %v4515_v6 = vld [vmem:[%s5381_s23 + $0x480] ss:$48 sps:$4 sm:$0xff]   ;;  %v4518_v7 = vld [vmem:[%s5381_s23 + $0x488] ss:$48 sps:$4 sm:$0xff]  }
  0xf7   : > { %v547_v9 = vrot.slane %v546_v8, 1 }
  0xf9   : > { %v548_v10 = vadd.f32 %v547_v9, %v546_v8  ;;  %v4523_v8 = vld [vmem:[%s5381_s23 + $0x4e4] ss:$48 sps:$4 sm:$0xff]   ;;  %v4526_v9 = vld [vmem:[%s5381_s23 + $0x4ec] ss:$48 sps:$4 sm:$0xff]  }
  0xfb   : > { %v549_v11 = vmul.f32 0.125, %v548_v10  ;;  %v4521_v10 = vld [vmem:[%s5381_s23 + $0x4e0] ss:$48 sps:$4 sm:$0xff]  }
  0xfd   : > { %v550_v12 = vadd.f32 1e-05, %v549_v11  ;;  %v4524_v11 = vld [vmem:[%s5381_s23 + $0x4e8] ss:$48 sps:$4 sm:$0xff]  }
  0xff   : > { %5015 = vrsqrt.f32 %v550_v12  ;;  %v4529_v12 = vld [vmem:[%s5381_s23 + $0x544] ss:$48 sps:$4 sm:$0xff]  }
 0x109   : > { %v5016_v14 = vpop.eup %5015 }
 0x10a   : > { %v552_v16 = vmul.f32 %v5016_v14, %v540_v2  ;;  %v4509_v2 = vld [vmem:[%s5381_s23 + $0x420] ss:$48 sps:$4 sm:$0xff]  }
 0x10b   : > { %v4527_v14 = vld [vmem:[%s5381_s23 + $0x540] ss:$48 sps:$4 sm:$0xff]  }
 0x10c   : > { %v559_v19 = vmul.f32 %v3905_v13, %v552_v16  ;;  %v4532_v13 = vld [vmem:[%s5381_s23 + $0x54c] ss:$48 sps:$4 sm:$0xff]   ;;  %v4535_v16 = vld [vmem:[%s5381_s23 + $0x5a4] ss:$48 sps:$4 sm:$0xff]  }
 0x10e   : > { %v566_v22 = vadd.f32 %v3906_v15, %v559_v19  ;;  %v4530_v15 = vld [vmem:[%s5381_s23 + $0x548] ss:$48 sps:$4 sm:$0xff]  }
 0x10f   : > { %v4536_v19 = vld [vmem:[%s5381_s23 + $0x5a8] ss:$48 sps:$4 sm:$0xff]  }
 0x110   : > { %3909 = vmatmul.mubr.msk.f32.vlgmr.msra.gmra.mrb[0].mxu0 %vm531_vm2, %v566_v22  ;;  %3912 = vmatmul.mubr.msk.f32.vlgmr.msra.gmra.mrb[0].mxu1 %vm531_vm2, %v566_v22  ;;  %v5476_v22 = vsub.s32 2, %v5385_v44 }
 0x111   : > { %3311 = vmatpush1.bf16.msra.mxu0 %v4443_v17  ;;  %3393 = vmatpush1.bf16.msra.mxu1 %v4446_v18  ;;  %v4538_v17 = vld [vmem:[%s5381_s23 + $0x5ac] ss:$48 sps:$4 sm:$0xff]   ;;  %v4533_v18 = vld [vmem:[%s5381_s23 + $0x5a0] ss:$48 sps:$4 sm:$0xff]  }
 0x112   : > { %3312 = vmatprep.subr.bf16.mxu0 %v4451_v20  ;;  %3394 = vmatprep.subr.bf16.mxu1 %v4454_v21  ;;  %v4541_v20 = vld [vmem:[%s5381_s23 + $0x604] ss:$48 sps:$4 sm:$0xff]   ;;  %v4544_v21 = vld [vmem:[%s5381_s23 + $0x60c] ss:$48 sps:$4 sm:$0xff]  }
 0x115   : > { %3313 = vmatpush1.bf16.msra.mxu0 %v4449_v23  ;;  %3395 = vmatpush1.bf16.msra.mxu1 %v4452_v24  ;;  %v619_v23 = vld [vmem:[%s5974_s8] sm:$0xf]  ;;  %v5482_v24 = vsub.s32 3, %v5385_v44 }
 0x116   : > { %3314 = vmatprep.subr.bf16.mxu0 %v4457_v25  ;;  %3396 = vmatprep.subr.bf16.mxu1 %v4460_v26  ;;  %v624_v25 = vrot.slane %v619_v23, %v5391_v46  ;;  %v632_v26 = vrot.slane %v619_v23, %v5476_v22 }
 0x119   : > { %3315 = vmatpush1.bf16.msra.mxu0 %v4455_v27  ;;  %3397 = vmatpush1.bf16.msra.mxu1 %v4458_v28  ;;  %v628_v27 = vrot.slane %v619_v23, %v5394_v47  ;;  %v636_v28 = vrot.slane %v619_v23, %v5482_v24 }
 0x11a   : > { %3316 = vmatprep.subr.bf16.mxu0 %v4463_v29  ;;  %3398 = vmatprep.subr.bf16.mxu1 %v4466_v30 }
 0x11d   : > { %3317 = vmatpush1.bf16.msra.mxu0 %v4461_v31  ;;  %3399 = vmatpush1.bf16.msra.mxu1 %v4464_v32 }
 0x11e   : > { %3318 = vmatprep.subr.bf16.mxu0 %v4469_v33  ;;  %3400 = vmatprep.subr.bf16.mxu1 %v4472_v34 }
 0x121   : > { %3319 = vmatpush1.bf16.msra.mxu0 %v4467_v35  ;;  %3401 = vmatpush1.bf16.msra.mxu1 %v4470_v36 }
 0x122   : > { %3320 = vmatprep.subr.bf16.mxu0 %v4475_v37  ;;  %3402 = vmatprep.subr.bf16.mxu1 %v4478_v38 }
 0x125   : > { %3321 = vmatpush1.bf16.msra.mxu0 %v4473_v39  ;;  %3403 = vmatpush1.bf16.msra.mxu1 %v4476_v40 }
 0x126   : > { %3322 = vmatprep.subr.bf16.mxu0 %v4481_v41  ;;  %3404 = vmatprep.subr.bf16.mxu1 %v4484_v42 }
 0x129   : > { %3323 = vmatpush1.bf16.msra.mxu0 %v4479_v43  ;;  %3405 = vmatpush1.bf16.msra.mxu1 %v4482_v45 }
 0x12a   : > { %3324 = vmatprep.subr.bf16.mxu0 %v4487_v48  ;;  %3406 = vmatprep.subr.bf16.mxu1 %v4490_v49 }
 0x12d   : > { %3325 = vmatpush1.bf16.msra.mxu0 %v4485_v50  ;;  %3407 = vmatpush1.bf16.msra.mxu1 %v4488_v51 }
 0x12e   : > { %3326 = vmatprep.subr.bf16.mxu0 %v4493_v52  ;;  %3408 = vmatprep.subr.bf16.mxu1 %v4496_v53 }
 0x131   : > { %3327 = vmatpush1.bf16.msra.mxu0 %v4491_v54  ;;  %3409 = vmatpush1.bf16.msra.mxu1 %v4494_v55 }
 0x132   : > { %3328 = vmatprep.subr.bf16.mxu0 %v4499_v56  ;;  %3410 = vmatprep.subr.bf16.mxu1 %v4502_v57 }
 0x135   : > { %3329 = vmatpush1.bf16.msra.mxu0 %v4497_v58  ;;  %3411 = vmatpush1.bf16.msra.mxu1 %v4500_v59 }
 0x136   : > { %3330 = vmatprep.subr.bf16.mxu0 %v4505_v60  ;;  %3412 = vmatprep.subr.bf16.mxu1 %v4508_v61 }
 0x139   : > { %3331 = vmatpush1.bf16.msra.mxu0 %v4503_v62  ;;  %3413 = vmatpush1.bf16.msra.mxu1 %v4506_v63 }
 0x13a   : > { %3332 = vmatprep.subr.bf16.mxu0 %v4511_v0  ;;  %3414 = vmatprep.subr.bf16.mxu1 %v4514_v1 }
 0x13d   : > { %3333 = vmatpush1.bf16.msra.mxu0 %v4509_v2  ;;  %3415 = vmatpush1.bf16.msra.mxu1 %v4512_v3 }
 0x13e   : > { %3334 = vmatprep.subr.bf16.mxu0 %v4517_v4  ;;  %3416 = vmatprep.subr.bf16.mxu1 %v4520_v5 }
 0x141   : > { %3335 = vmatpush1.bf16.msra.mxu0 %v4515_v6  ;;  %3417 = vmatpush1.bf16.msra.mxu1 %v4518_v7 }
 0x142   : > { %3336 = vmatprep.subr.bf16.mxu0 %v4523_v8  ;;  %3418 = vmatprep.subr.bf16.mxu1 %v4526_v9 }
 0x145   : > { %3337 = vmatpush1.bf16.msra.mxu0 %v4521_v10  ;;  %3419 = vmatpush1.bf16.msra.mxu1 %v4524_v11 }
 0x146   : > { %3338 = vmatprep.subr.bf16.mxu0 %v4529_v12  ;;  %3420 = vmatprep.subr.bf16.mxu1 %v4532_v13 }
 0x149   : > { %3339 = vmatpush1.bf16.msra.mxu0 %v4527_v14  ;;  %3421 = vmatpush1.bf16.msra.mxu1 %v4530_v15 }
 0x14a   : > { %3340 = vmatprep.subr.bf16.mxu0 %v4535_v16  ;;  %3422 = vmatprep.subr.bf16.mxu1 %v4538_v17 }
 0x14d   : > { %3341 = vmatpush1.bf16.msra.mxu0 %v4533_v18  ;;  %3423 = vmatpush1.bf16.msra.mxu1 %v4536_v19 }
 0x14e   : > { %3351 = vmatprep.subr.bf16.mxu0 %v4541_v20  ;;  %3433 = vmatprep.subr.bf16.mxu1 %v4544_v21 }
 0x1e3   : > { %v723_v29 = vpop.f32.mrb[0].mxu0  ;;  %v794_v30 = vpop.f32.mrb[0].mxu1 }
 0x1e4   : > { %v724_v31 = vadd.f32 %v723_v29, %v624_v25  ;;  %v795_v32 = vadd.f32 %v794_v30, %v632_v26  ;;  %v725_v33 = vpop.f32.mrb[1].mxu0  ;;  %v796_v34 = vpop.f32.mrb[1].mxu1 }
 0x1e5   : > { %v726_v35 = vadd.f32 %v725_v33, %v628_v27  ;;  %v797_v36 = vadd.f32 %v796_v34, %v636_v28 }
 0x1e6   : > { %v799_v37 = vmax.f32 %v724_v31, 0.0  ;;  %v801_v38 = vmax.f32 %v795_v32, 0.0 }
 0x1e7   : > { %v800_v39 = vmax.f32 %v726_v35, 0.0  ;;  %v802_v40 = vmax.f32 %v797_v36, 0.0 }
 0x1e8   : > { %v805_v41 = vrot.slane %v799_v37, 4  ;;  %v817_v42 = vrot.slane %v801_v38, 4 }
 0x1e9   : > { %v811_v43 = vrot.slane %v800_v39, 4  ;;  %v824_v45 = vsel %vm823_vm3, %v802_v40, 0.0 }
 0x1ea   : > { %v806_v48 = vadd.f32 %v805_v41, %v799_v37  ;;  %v818_v49 = vadd.f32 %v817_v42, %v801_v38  ;;  %v825_v50 = vrot.slane %v824_v45, 4 }
 0x1eb   : > { %v812_v51 = vadd.f32 %v811_v43, %v800_v39 }
 0x1ec   : > { %v807_v52 = vrot.slane %v806_v48, 2  ;;  %v819_v53 = vrot.slane %v818_v49, 2  ;;  %v826_v54 = vadd.f32 %v825_v50, %v824_v45 }
 0x1ed   : > { %v813_v55 = vrot.slane %v812_v51, 2 }
 0x1ee   : > { %v808_v56 = vadd.f32 %v807_v52, %v806_v48  ;;  %v820_v57 = vadd.f32 %v819_v53, %v818_v49  ;;  %v827_v58 = vrot.slane %v826_v54, 2 }
 0x1ef   : > { %v814_v59 = vadd.f32 %v813_v55, %v812_v51  ;;  %v803_v55 = vld [vmem:[%s5975_s9] sm:$0xf] }
 0x1f0   : > { %v809_v60 = vrot.slane %v808_v56, 1  ;;  %v821_v61 = vrot.slane %v820_v57, 1  ;;  %v828_v62 = vadd.f32 %v827_v58, %v826_v54 }
 0x1f1   : > { %v815_v63 = vrot.slane %v814_v59, 1 }
 0x1f2   : > { %v810_v0 = vadd.f32 %v809_v60, %v808_v56  ;;  %v822_v1 = vadd.f32 %v821_v61, %v820_v57  ;;  %v829_v2 = vrot.slane %v828_v62, 1  ;;  %v804_v56 = vld [vmem:[%s5976_s10] sm:$0xf]  ;;  %v888_v57 = vrot.slane %v803_v55, %v5391_v46 }
 0x1f3   : > { %v816_v3 = vadd.f32 %v815_v63, %v814_v59  ;;  %v896_v59 = vrot.slane %v803_v55, %v5476_v22 }
 0x1f4   : > { %v831_v4 = vmul.f32 0.125, %v810_v0  ;;  %v833_v5 = vmul.f32 0.125, %v822_v1  ;;  %v830_v6 = vadd.f32 %v829_v2, %v828_v62  ;;  %v892_v62 = vrot.slane %v803_v55, %v5394_v47 }
 0x1f5   : > { %v832_v7 = vmul.f32 0.125, %v816_v3  ;;  %v913_v0 = vrot.slane %v804_v56, %v5391_v46  ;;  %v921_v2 = vrot.slane %v804_v56, %v5476_v22  ;;  %v900_v3 = vrot.slane %v803_v55, %v5482_v24  ;;  %v4589_v55 = vld [vmem:[%s5381_s23 + $0x904] ss:$48 sps:$4 sm:$0xff]  }
 0x1f6   : > { %v835_v8 = vsub.f32 %v799_v37, %v831_v4  ;;  %v837_v9 = vsub.f32 %v801_v38, %v833_v5  ;;  %v834_v10 = vmul.f32 0.125, %v830_v6 }
 0x1f7   : > { %v836_v11 = vsub.f32 %v800_v39, %v832_v7  ;;  %v917_v7 = vrot.slane %v804_v56, %v5394_v47 }
 0x1f8   : > { %v839_v12 = vmul.f32 %v835_v8, %v835_v8  ;;  %v841_v13 = vmul.f32 %v837_v9, %v837_v9  ;;  %v838_v14 = vsub.f32 %v802_v40, %v834_v10 }
 0x1f9   : > { %v840_v15 = vmul.f32 %v836_v11, %v836_v11 }
 0x1fa   : > { %v843_v16 = vrot.slane %v839_v12, 4  ;;  %v855_v17 = vrot.slane %v841_v13, 4  ;;  %v842_v18 = vmul.f32 %v838_v14, %v838_v14 }
 0x1fb   : > { %v849_v19 = vrot.slane %v840_v15, 4 }
 0x1fc   : > { %v844_v20 = vadd.f32 %v843_v16, %v839_v12  ;;  %v856_v21 = vadd.f32 %v855_v17, %v841_v13  ;;  %v861_v23 = vsel %vm823_vm3, %v842_v18, 0.0  ;;  %v925_v12 = vrot.slane %v804_v56, %v5482_v24  ;;  %v4592_v56 = vld [vmem:[%s5381_s23 + $0x90c] ss:$48 sps:$4 sm:$0xff]  }
 0x1fd   : > { %v850_v25 = vadd.f32 %v849_v19, %v840_v15  ;;  %v862_v26 = vrot.slane %v861_v23, 4 }
 0x1fe   : > { %v845_v27 = vrot.slane %v844_v20, 2  ;;  %v857_v28 = vrot.slane %v856_v21, 2 }
 0x1ff   : > { %v851_v29 = vrot.slane %v850_v25, 2  ;;  %v863_v30 = vadd.f32 %v862_v26, %v861_v23  ;;  %v4547_v23 = vld [vmem:[%s5381_s23 + $0x664] ss:$48 sps:$4 sm:$0xff]   ;;  %v4545_v26 = vld [vmem:[%s5381_s23 + $0x660] ss:$48 sps:$4 sm:$0xff]  }
 0x200   : > { %v846_v31 = vadd.f32 %v845_v27, %v844_v20  ;;  %v858_v32 = vadd.f32 %v857_v28, %v856_v21  ;;  %v4542_v20 = vld [vmem:[%s5381_s23 + $0x608] ss:$48 sps:$4 sm:$0xff]   ;;  %v4553_v28 = vld [vmem:[%s5381_s23 + $0x6c4] ss:$48 sps:$4 sm:$0xff]  }
 0x201   : > { %v852_v33 = vadd.f32 %v851_v29, %v850_v25  ;;  %v864_v34 = vrot.slane %v863_v30, 2  ;;  %v4550_v25 = vld [vmem:[%s5381_s23 + $0x66c] ss:$48 sps:$4 sm:$0xff]   ;;  %v4548_v27 = vld [vmem:[%s5381_s23 + $0x668] ss:$48 sps:$4 sm:$0xff]  }
 0x202   : > { %v847_v35 = vrot.slane %v846_v31, 1  ;;  %v859_v36 = vrot.slane %v858_v32, 1  ;;  %v4556_v29 = vld [vmem:[%s5381_s23 + $0x6cc] ss:$48 sps:$4 sm:$0xff]  }
 0x203   : > { %v853_v37 = vrot.slane %v852_v33, 1  ;;  %v865_v38 = vadd.f32 %v864_v34, %v863_v30  ;;  %v4551_v30 = vld [vmem:[%s5381_s23 + $0x6c0] ss:$48 sps:$4 sm:$0xff]  }
 0x204   : > { %v848_v39 = vadd.f32 %v847_v35, %v846_v31  ;;  %v860_v40 = vadd.f32 %v859_v36, %v858_v32  ;;  %v4554_v31 = vld [vmem:[%s5381_s23 + $0x6c8] ss:$48 sps:$4 sm:$0xff]   ;;  %v4559_v32 = vld [vmem:[%s5381_s23 + $0x724] ss:$48 sps:$4 sm:$0xff]   ;;  %v4557_v34 = vld [vmem:[%s5381_s23 + $0x720] ss:$48 sps:$4 sm:$0xff]  }
 0x205   : > { %v854_v41 = vadd.f32 %v853_v37, %v852_v33  ;;  %v866_v42 = vrot.slane %v865_v38, 1  ;;  %v4562_v33 = vld [vmem:[%s5381_s23 + $0x72c] ss:$48 sps:$4 sm:$0xff]   ;;  %v4560_v35 = vld [vmem:[%s5381_s23 + $0x728] ss:$48 sps:$4 sm:$0xff]  }
 0x206   : > { %v868_v43 = vmul.f32 0.125, %v848_v39  ;;  %v870_v45 = vmul.f32 0.125, %v860_v40  ;;  %v4565_v36 = vld [vmem:[%s5381_s23 + $0x784] ss:$48 sps:$4 sm:$0xff]   ;;  %v4568_v37 = vld [vmem:[%s5381_s23 + $0x78c] ss:$48 sps:$4 sm:$0xff]  }
 0x207   : > { %v869_v48 = vmul.f32 0.125, %v854_v41  ;;  %v867_v49 = vadd.f32 %v866_v42, %v865_v38  ;;  %v4563_v38 = vld [vmem:[%s5381_s23 + $0x780] ss:$48 sps:$4 sm:$0xff]   ;;  %v4566_v39 = vld [vmem:[%s5381_s23 + $0x788] ss:$48 sps:$4 sm:$0xff]  }
 0x208   : > { %v872_v50 = vadd.f32 1e-05, %v868_v43  ;;  %v874_v51 = vadd.f32 1e-05, %v870_v45  ;;  %v4571_v40 = vld [vmem:[%s5381_s23 + $0x7e4] ss:$48 sps:$4 sm:$0xff]  }
 0x209   : > { %v873_v52 = vadd.f32 1e-05, %v869_v48  ;;  %v871_v53 = vmul.f32 0.125, %v867_v49  ;;  %v4574_v41 = vld [vmem:[%s5381_s23 + $0x7ec] ss:$48 sps:$4 sm:$0xff]  }
 0x20a   : > { %5017 = vrsqrt.f32 %v872_v50  ;;  %v4569_v42 = vld [vmem:[%s5381_s23 + $0x7e0] ss:$48 sps:$4 sm:$0xff]   ;;  %v4572_v43 = vld [vmem:[%s5381_s23 + $0x7e8] ss:$48 sps:$4 sm:$0xff]   ;;  %v4577_v45 = vld [vmem:[%s5381_s23 + $0x844] ss:$48 sps:$4 sm:$0xff]  }
 0x20b   : > { %5019 = vrsqrt.f32 %v874_v51  ;;  %v875_v54 = vadd.f32 1e-05, %v871_v53  ;;  %v4580_v48 = vld [vmem:[%s5381_s23 + $0x84c] ss:$48 sps:$4 sm:$0xff]   ;;  %v4575_v49 = vld [vmem:[%s5381_s23 + $0x840] ss:$48 sps:$4 sm:$0xff]  }
 0x20c   : > { %5021 = vrsqrt.f32 %v873_v52  ;;  %v4578_v50 = vld [vmem:[%s5381_s23 + $0x848] ss:$48 sps:$4 sm:$0xff]   ;;  %v4583_v51 = vld [vmem:[%s5381_s23 + $0x8a4] ss:$48 sps:$4 sm:$0xff]   ;;  %v4586_v52 = vld [vmem:[%s5381_s23 + $0x8ac] ss:$48 sps:$4 sm:$0xff]  }
 0x20d   : > { %5023 = vrsqrt.f32 %v875_v54  ;;  %v4581_v53 = vld [vmem:[%s5381_s23 + $0x8a0] ss:$48 sps:$4 sm:$0xff]   ;;  %v4584_v54 = vld [vmem:[%s5381_s23 + $0x8a8] ss:$48 sps:$4 sm:$0xff]  }
 0x214   : > { %v5018_v58 = vpop.eup %5017 }
 0x215   : > { %v5020_v60 = vpop.eup %5019  ;;  %v880_v61 = vmul.f32 %v5018_v58, %v835_v8  ;;  %v4590_v58 = vld [vmem:[%s5381_s23 + $0x908] ss:$48 sps:$4 sm:$0xff]  }
 0x216   : > { %v5022_v63 = vpop.eup %5021  ;;  %v882_v1 = vmul.f32 %v5020_v60, %v837_v9  ;;  %v4598_v60 = vld [vmem:[%s5381_s23 + $0x96c] ss:$48 sps:$4 sm:$0xff]  }
 0x217   : > { %v5024_v4 = vpop.eup %5023  ;;  %v905_v5 = vmul.f32 %v888_v57, %v880_v61  ;;  %v881_v6 = vmul.f32 %v5022_v63, %v836_v11  ;;  %v4539_v11 = vld [vmem:[%s5381_s23 + $0x600] ss:$48 sps:$4 sm:$0xff]   ;;  %v4601_v63 = vld [vmem:[%s5381_s23 + $0x9c4] ss:$48 sps:$4 sm:$0xff]  }
 0x218   : > { %v907_v10 = vmul.f32 %v896_v59, %v882_v1  ;;  %v883_v8 = vmul.f32 %v5024_v4, %v838_v14  ;;  %v4587_v57 = vld [vmem:[%s5381_s23 + $0x900] ss:$48 sps:$4 sm:$0xff]   ;;  %v4595_v59 = vld [vmem:[%s5381_s23 + $0x964] ss:$48 sps:$4 sm:$0xff]   ;;  %v4610_v4 = vld [vmem:[%s5381_s23 + $0xa2c] ss:$48 sps:$4 sm:$0xff]  }
 0x219   : > { %v906_v13 = vmul.f32 %v892_v62, %v881_v6  ;;  %v930_v15 = vadd.f32 %v913_v0, %v905_v5  ;;  %v4593_v61 = vld [vmem:[%s5381_s23 + $0x960] ss:$48 sps:$4 sm:$0xff]   ;;  %v4596_v62 = vld [vmem:[%s5381_s23 + $0x968] ss:$48 sps:$4 sm:$0xff]   ;;  %v4604_v0 = vld [vmem:[%s5381_s23 + $0x9cc] ss:$48 sps:$4 sm:$0xff]  }
 0x21a   : > { %v5504_v9 = vadd.f32 %v921_v2, %v907_v10  ;;  %v908_v16 = vmul.f32 %v900_v3, %v883_v8  ;;  %v4599_v1 = vld [vmem:[%s5381_s23 + $0x9c0] ss:$48 sps:$4 sm:$0xff]   ;;  %v4602_v2 = vld [vmem:[%s5381_s23 + $0x9c8] ss:$48 sps:$4 sm:$0xff]   ;;  %v4607_v3 = vld [vmem:[%s5381_s23 + $0xa24] ss:$48 sps:$4 sm:$0xff]  }
 0x21b   : > { %v931_v17 = vadd.f32 %v917_v7, %v906_v13  ;;  %v5510_v21 = vpack.c.bf16 %v930_v15, %v930_v15  ;;  %v4605_v5 = vld [vmem:[%s5381_s23 + $0xa20] ss:$48 sps:$4 sm:$0xff]   ;;  %v4608_v6 = vld [vmem:[%s5381_s23 + $0xa28] ss:$48 sps:$4 sm:$0xff]   ;;  %v4613_v7 = vld [vmem:[%s5381_s23 + $0xa84] ss:$48 sps:$4 sm:$0xff]  }
 0x21c   : > { %v933_v18 = vadd.f32 %v925_v12, %v908_v16  ;;  %v4616_v10 = vld [vmem:[%s5381_s23 + $0xa8c] ss:$48 sps:$4 sm:$0xff]   ;;  %v4611_v8 = vld [vmem:[%s5381_s23 + $0xa80] ss:$48 sps:$4 sm:$0xff]   ;;  %v4614_v12 = vld [vmem:[%s5381_s23 + $0xa88] ss:$48 sps:$4 sm:$0xff]  }
 0x21d   : > { %v5506_v19 = vpack.c.bf16 %v931_v17, %v931_v17  ;;  %v4619_v13 = vld [vmem:[%s5381_s23 + $0xae4] ss:$48 sps:$4 sm:$0xff]   ;;  %v4622_v15 = vld [vmem:[%s5381_s23 + $0xaec] ss:$48 sps:$4 sm:$0xff]   ;;  %v4617_v16 = vld [vmem:[%s5381_s23 + $0xae0] ss:$48 sps:$4 sm:$0xff]  }
 0x21e   : > { %v5512_v14 = vpack.c.bf16 %v933_v18, %v933_v18  ;;  %v4620_v17 = vld [vmem:[%s5381_s23 + $0xae8] ss:$48 sps:$4 sm:$0xff]   ;;  %v4625_v18 = vld [vmem:[%s5381_s23 + $0xb44] ss:$48 sps:$4 sm:$0xff]  }
 0x21f   : > { %3342 = vmatprep.mubr.bf16.mxu0 %v5506_v19  ;;  %3424 = vmatprep.mubr.bf16.mxu1 %v5506_v19 }
 0x220   : > { %3343 = vmatmul.mubr.bf16.vlgmr.msra.gmra.mrb[4].mxu0 %v5510_v21  ;;  %3425 = vmatmul.mubr.bf16.vlgmr.msra.gmra.mrb[4].mxu1 %v5510_v21 }
 0x221   : > { %3352 = vmatpush1.bf16.msra.mxu0 %v4539_v11  ;;  %3434 = vmatpush1.bf16.msra.mxu1 %v4542_v20  ;;  %v4628_v11 = vld [vmem:[%s5381_s23 + $0xb4c] ss:$48 sps:$4 sm:$0xff]   ;;  %v1310_v20 = vld [vmem:[%s5381_s23 + $0xba0] sm:$0x33] }
 0x222   : > { %4298 = vmatprep.mubr.msk.bf16.mxu0 %vm823_vm3, %v5512_v14  ;;  %4300 = vmatprep.mubr.msk.bf16.mxu1 %vm823_vm3, %v5512_v14 }
 0x223   : > { %3353 = vmatprep.subr.bf16.mxu0 %v4547_v23  ;;  %3435 = vmatprep.subr.bf16.mxu1 %v4550_v25  ;;  %v1311_v23 = vld [vmem:[%s5381_s23 + $0xba8] sm:$0x33]  ;;  %v4623_v25 = vld [vmem:[%s5381_s23 + $0xb40] ss:$48 sps:$4 sm:$0xff]  }
 0x225   : > { %3354 = vmatpush1.bf16.msra.mxu0 %v4545_v26  ;;  %3436 = vmatpush1.bf16.msra.mxu1 %v4548_v27  ;;  %v4626_v26 = vld [vmem:[%s5381_s23 + $0xb48] ss:$48 sps:$4 sm:$0xff]   ;;  %v4286_v27 = vcombine.high %v1310_v20, %v1310_v20 }
 0x226   : > { %3355 = vmatprep.subr.bf16.mxu0 %v4553_v28  ;;  %3437 = vmatprep.subr.bf16.mxu1 %v4556_v29  ;;  %v4288_v28 = vcombine.high %v1311_v23, %v1311_v23  ;;  %v4285_v29 = vcombine.low %v1310_v20, %v1310_v20  ;;  %v4704_v20 = vld [vmem:[%s5381_s23 + $0x43c] ss:$48 sps:$4 sm:$0xff]  }
 0x229   : > { %3356 = vmatpush1.bf16.msra.mxu0 %v4551_v30  ;;  %3438 = vmatpush1.bf16.msra.mxu1 %v4554_v31  ;;  %v4287_v30 = vcombine.low %v1311_v23, %v1311_v23  ;;  %v3275_v31 = vsel %vm3273_vm4, %v4285_v29, 0  ;;  %v4699_v23 = vld [vmem:[%s5381_s23 + $0x430] ss:$48 sps:$4 sm:$0xff]   ;;  %v4708_v29 = vld [vmem:[%s5381_s23 + $0x498] ss:$48 sps:$4 sm:$0xff]  }
 0x22a   : > { %3357 = vmatprep.subr.bf16.mxu0 %v4559_v32  ;;  %3439 = vmatprep.subr.bf16.mxu1 %v4562_v33  ;;  %v4635_v33 = vld [vmem:[%s5381_s23 + $0x14] ss:$48 sps:$4 sm:$0xff]  }
 0x22b   : > { %v3281_v32 = vsel %vm3273_vm4, %v4287_v30, 0  ;;  %v4713_v30 = vld [vmem:[%s5381_s23 + $0x4f4] ss:$48 sps:$4 sm:$0xff]  }
 0x22d   : > { %3358 = vmatpush1.bf16.msra.mxu0 %v4557_v34  ;;  %3440 = vmatpush1.bf16.msra.mxu1 %v4560_v35  ;;  %v4638_v34 = vld [vmem:[%s5381_s23 + $0x1c] ss:$48 sps:$4 sm:$0xff]   ;;  %v4633_v35 = vld [vmem:[%s5381_s23 + $0x10] ss:$48 sps:$4 sm:$0xff]  }
 0x22e   : > { %3359 = vmatprep.subr.bf16.mxu0 %v4565_v36  ;;  %3441 = vmatprep.subr.bf16.mxu1 %v4568_v37  ;;  %v5589_v36 = vpack.c.bf16 %v5504_v9, %v5504_v9  ;;  %v4636_v37 = vld [vmem:[%s5381_s23 + $0x18] ss:$48 sps:$4 sm:$0xff]  }
 0x22f   : > { %v4642_v9 = vld [vmem:[%s5381_s23 + $0x78] ss:$48 sps:$4 sm:$0xff]  }
 0x231   : > { %3360 = vmatpush1.bf16.msra.mxu0 %v4563_v38  ;;  %3442 = vmatpush1.bf16.msra.mxu1 %v4566_v39  ;;  %v4641_v38 = vld [vmem:[%s5381_s23 + $0x74] ss:$48 sps:$4 sm:$0xff]   ;;  %v4644_v39 = vld [vmem:[%s5381_s23 + $0x7c] ss:$48 sps:$4 sm:$0xff]  }
 0x232   : > { %3361 = vmatprep.subr.bf16.mxu0 %v4571_v40  ;;  %3443 = vmatprep.subr.bf16.mxu1 %v4574_v41  ;;  %v4639_v40 = vld [vmem:[%s5381_s23 + $0x70] ss:$48 sps:$4 sm:$0xff]   ;;  %v4647_v41 = vld [vmem:[%s5381_s23 + $0xd4] ss:$48 sps:$4 sm:$0xff]  }
 0x235   : > { %3362 = vmatpush1.bf16.msra.mxu0 %v4569_v42  ;;  %3444 = vmatpush1.bf16.msra.mxu1 %v4572_v43  ;;  %v4650_v42 = vld [vmem:[%s5381_s23 + $0xdc] ss:$48 sps:$4 sm:$0xff]   ;;  %v4645_v43 = vld [vmem:[%s5381_s23 + $0xd0] ss:$48 sps:$4 sm:$0xff]  }
 0x236   : > { %3363 = vmatprep.subr.bf16.mxu0 %v4577_v45  ;;  %3445 = vmatprep.subr.bf16.mxu1 %v4580_v48  ;;  %v4648_v45 = vld [vmem:[%s5381_s23 + $0xd8] ss:$48 sps:$4 sm:$0xff]   ;;  %v4653_v48 = vld [vmem:[%s5381_s23 + $0x134] ss:$48 sps:$4 sm:$0xff]  }
 0x239   : > { %3364 = vmatpush1.bf16.msra.mxu0 %v4575_v49  ;;  %3446 = vmatpush1.bf16.msra.mxu1 %v4578_v50  ;;  %v4656_v49 = vld [vmem:[%s5381_s23 + $0x13c] ss:$48 sps:$4 sm:$0xff]   ;;  %v4651_v50 = vld [vmem:[%s5381_s23 + $0x130] ss:$48 sps:$4 sm:$0xff]  }
 0x23a   : > { %3365 = vmatprep.subr.bf16.mxu0 %v4583_v51  ;;  %3447 = vmatprep.subr.bf16.mxu1 %v4586_v52  ;;  %v4654_v51 = vld [vmem:[%s5381_s23 + $0x138] ss:$48 sps:$4 sm:$0xff]   ;;  %v4659_v52 = vld [vmem:[%s5381_s23 + $0x194] ss:$48 sps:$4 sm:$0xff]  }
 0x23d   : > { %3366 = vmatpush1.bf16.msra.mxu0 %v4581_v53  ;;  %3448 = vmatpush1.bf16.msra.mxu1 %v4584_v54  ;;  %v4662_v53 = vld [vmem:[%s5381_s23 + $0x19c] ss:$48 sps:$4 sm:$0xff]   ;;  %v4657_v54 = vld [vmem:[%s5381_s23 + $0x190] ss:$48 sps:$4 sm:$0xff]  }
 0x23e   : > { %3367 = vmatprep.subr.bf16.mxu0 %v4589_v55  ;;  %3449 = vmatprep.subr.bf16.mxu1 %v4592_v56  ;;  %v4660_v55 = vld [vmem:[%s5381_s23 + $0x198] ss:$48 sps:$4 sm:$0xff]   ;;  %v4665_v56 = vld [vmem:[%s5381_s23 + $0x1f4] ss:$48 sps:$4 sm:$0xff]  }
 0x241   : > { %3368 = vmatpush1.bf16.msra.mxu0 %v4587_v57  ;;  %3450 = vmatpush1.bf16.msra.mxu1 %v4590_v58  ;;  %v4668_v57 = vld [vmem:[%s5381_s23 + $0x1fc] ss:$48 sps:$4 sm:$0xff]   ;;  %v4663_v58 = vld [vmem:[%s5381_s23 + $0x1f0] ss:$48 sps:$4 sm:$0xff]  }
 0x242   : > { %3369 = vmatprep.subr.bf16.mxu0 %v4595_v59  ;;  %3451 = vmatprep.subr.bf16.mxu1 %v4598_v60  ;;  %v4666_v59 = vld [vmem:[%s5381_s23 + $0x1f8] ss:$48 sps:$4 sm:$0xff]   ;;  %v4671_v60 = vld [vmem:[%s5381_s23 + $0x254] ss:$48 sps:$4 sm:$0xff]  }
 0x245   : > { %3370 = vmatpush1.bf16.msra.mxu0 %v4593_v61  ;;  %3452 = vmatpush1.bf16.msra.mxu1 %v4596_v62  ;;  %v4674_v61 = vld [vmem:[%s5381_s23 + $0x25c] ss:$48 sps:$4 sm:$0xff]   ;;  %v4669_v62 = vld [vmem:[%s5381_s23 + $0x250] ss:$48 sps:$4 sm:$0xff]  }
 0x246   : > { %3371 = vmatprep.subr.bf16.mxu0 %v4601_v63  ;;  %3453 = vmatprep.subr.bf16.mxu1 %v4604_v0  ;;  %v4672_v63 = vld [vmem:[%s5381_s23 + $0x258] ss:$48 sps:$4 sm:$0xff]   ;;  %v4677_v0 = vld [vmem:[%s5381_s23 + $0x2b4] ss:$48 sps:$4 sm:$0xff]  }
 0x249   : > { %3372 = vmatpush1.bf16.msra.mxu0 %v4599_v1  ;;  %3454 = vmatpush1.bf16.msra.mxu1 %v4602_v2  ;;  %v4680_v1 = vld [vmem:[%s5381_s23 + $0x2bc] ss:$48 sps:$4 sm:$0xff]   ;;  %v4675_v2 = vld [vmem:[%s5381_s23 + $0x2b0] ss:$48 sps:$4 sm:$0xff]  }
 0x24a   : > { %3373 = vmatprep.subr.bf16.mxu0 %v4607_v3  ;;  %3455 = vmatprep.subr.bf16.mxu1 %v4610_v4  ;;  %v4678_v3 = vld [vmem:[%s5381_s23 + $0x2b8] ss:$48 sps:$4 sm:$0xff]   ;;  %v4683_v4 = vld [vmem:[%s5381_s23 + $0x314] ss:$48 sps:$4 sm:$0xff]  }
 0x24d   : > { %3374 = vmatpush1.bf16.msra.mxu0 %v4605_v5  ;;  %3456 = vmatpush1.bf16.msra.mxu1 %v4608_v6  ;;  %v4686_v5 = vld [vmem:[%s5381_s23 + $0x31c] ss:$48 sps:$4 sm:$0xff]   ;;  %v4681_v6 = vld [vmem:[%s5381_s23 + $0x310] ss:$48 sps:$4 sm:$0xff]  }
 0x24e   : > { %3375 = vmatprep.subr.bf16.mxu0 %v4613_v7  ;;  %3457 = vmatprep.subr.bf16.mxu1 %v4616_v10  ;;  %v4684_v7 = vld [vmem:[%s5381_s23 + $0x318] ss:$48 sps:$4 sm:$0xff]   ;;  %v4689_v10 = vld [vmem:[%s5381_s23 + $0x374] ss:$48 sps:$4 sm:$0xff]  }
 0x251   : > { %3376 = vmatpush1.bf16.msra.mxu0 %v4611_v8  ;;  %3458 = vmatpush1.bf16.msra.mxu1 %v4614_v12  ;;  %v4692_v8 = vld [vmem:[%s5381_s23 + $0x37c] ss:$48 sps:$4 sm:$0xff]   ;;  %v4687_v12 = vld [vmem:[%s5381_s23 + $0x370] ss:$48 sps:$4 sm:$0xff]  }
 0x252   : > { %3377 = vmatprep.subr.bf16.mxu0 %v4619_v13  ;;  %3459 = vmatprep.subr.bf16.mxu1 %v4622_v15  ;;  %v4690_v13 = vld [vmem:[%s5381_s23 + $0x378] ss:$48 sps:$4 sm:$0xff]   ;;  %v4695_v15 = vld [vmem:[%s5381_s23 + $0x3d4] ss:$48 sps:$4 sm:$0xff]  }
 0x255   : > { %3378 = vmatpush1.bf16.msra.mxu0 %v4617_v16  ;;  %3460 = vmatpush1.bf16.msra.mxu1 %v4620_v17  ;;  %v4698_v16 = vld [vmem:[%s5381_s23 + $0x3dc] ss:$48 sps:$4 sm:$0xff]   ;;  %v4693_v17 = vld [vmem:[%s5381_s23 + $0x3d0] ss:$48 sps:$4 sm:$0xff]  }
 0x256   : > { %3379 = vmatprep.subr.bf16.mxu0 %v4625_v18  ;;  %3461 = vmatprep.subr.bf16.mxu1 %v4628_v11  ;;  %v4696_v18 = vld [vmem:[%s5381_s23 + $0x3d8] ss:$48 sps:$4 sm:$0xff]   ;;  %v4701_v11 = vld [vmem:[%s5381_s23 + $0x434] ss:$48 sps:$4 sm:$0xff]  }
 0x259   : > { %3380 = vmatpush1.bf16.msra.mxu0 %v4623_v25  ;;  %3462 = vmatpush1.bf16.msra.mxu1 %v4626_v26  ;;  %v4702_v25 = vld [vmem:[%s5381_s23 + $0x438] ss:$48 sps:$4 sm:$0xff]   ;;  %v4707_v26 = vld [vmem:[%s5381_s23 + $0x494] ss:$48 sps:$4 sm:$0xff]  }
 0x25a   : > { %4297 = vmatprep.subr.msk.bf16.mxu0 %vm3273_vm4, %v4286_v27  ;;  %4299 = vmatprep.subr.msk.bf16.mxu1 %vm3273_vm4, %v4288_v28  ;;  %v4710_v27 = vld [vmem:[%s5381_s23 + $0x49c] ss:$48 sps:$4 sm:$0xff]   ;;  %v4705_v28 = vld [vmem:[%s5381_s23 + $0x490] ss:$48 sps:$4 sm:$0xff]  }
 0x25d   : > { %3382 = vmatpush1.bf16.msra.mxu0 %v3275_v31  ;;  %3464 = vmatpush1.bf16.msra.mxu1 %v3281_v32  ;;  %v4716_v31 = vld [vmem:[%s5381_s23 + $0x4fc] ss:$48 sps:$4 sm:$0xff]   ;;  %v4711_v32 = vld [vmem:[%s5381_s23 + $0x4f0] ss:$48 sps:$4 sm:$0xff]  }
 0x25e   : > { %3474 = vmatprep.subr.bf16.mxu0 %v4635_v33  ;;  %3556 = vmatprep.subr.bf16.mxu1 %v4638_v34  ;;  %v4714_v33 = vld [vmem:[%s5381_s23 + $0x4f8] ss:$48 sps:$4 sm:$0xff]   ;;  %v4719_v34 = vld [vmem:[%s5381_s23 + $0x554] ss:$48 sps:$4 sm:$0xff]  }
 0x260   : > { %3384 = vmatmul.mubr.bf16.vlgmr.msra.gmra.mrb[4].mxu0 %v5589_v36  ;;  %3466 = vmatmul.mubr.bf16.vlgmr.msra.gmra.mrb[4].mxu1 %v5589_v36 }
 0x261   : > { %3475 = vmatpush1.bf16.msra.mxu0 %v4633_v35  ;;  %3506 = vmatprep.mubr.bf16.mxu0 %v5506_v19  ;;  %v4722_v35 = vld [vmem:[%s5381_s23 + $0x55c] ss:$48 sps:$4 sm:$0xff]  }
 0x262   : > { %3557 = vmatpush1.bf16.msra.mxu1 %v4636_v37  ;;  %3588 = vmatprep.mubr.bf16.mxu1 %v5506_v19  ;;  %v4717_v37 = vld [vmem:[%s5381_s23 + $0x550] ss:$48 sps:$4 sm:$0xff]  }
 0x263   : > { %3476 = vmatprep.subr.bf16.mxu0 %v4641_v38  ;;  %3558 = vmatprep.subr.bf16.mxu1 %v4644_v39  ;;  %v4720_v38 = vld [vmem:[%s5381_s23 + $0x558] ss:$48 sps:$4 sm:$0xff]   ;;  %v4725_v39 = vld [vmem:[%s5381_s23 + $0x5b4] ss:$48 sps:$4 sm:$0xff]  }
 0x265   : > { %3477 = vmatpush1.bf16.msra.mxu0 %v4639_v40  ;;  %v4728_v40 = vld [vmem:[%s5381_s23 + $0x5bc] ss:$48 sps:$4 sm:$0xff]  }
 0x266   : > { %3559 = vmatpush1.bf16.msra.mxu1 %v4642_v9  ;;  %3478 = vmatprep.subr.bf16.mxu0 %v4647_v41  ;;  %v4723_v9 = vld [vmem:[%s5381_s23 + $0x5b0] ss:$48 sps:$4 sm:$0xff]   ;;  %v4726_v41 = vld [vmem:[%s5381_s23 + $0x5b8] ss:$48 sps:$4 sm:$0xff]  }
 0x267   : > { %3560 = vmatprep.subr.bf16.mxu1 %v4650_v42  ;;  %v4731_v42 = vld [vmem:[%s5381_s23 + $0x614] ss:$48 sps:$4 sm:$0xff]  }
 0x269   : > { %3479 = vmatpush1.bf16.msra.mxu0 %v4645_v43  ;;  %v4734_v43 = vld [vmem:[%s5381_s23 + $0x61c] ss:$48 sps:$4 sm:$0xff]  }
 0x26a   : > { %3561 = vmatpush1.bf16.msra.mxu1 %v4648_v45  ;;  %3480 = vmatprep.subr.bf16.mxu0 %v4653_v48  ;;  %v4729_v45 = vld [vmem:[%s5381_s23 + $0x610] ss:$48 sps:$4 sm:$0xff]   ;;  %v4732_v48 = vld [vmem:[%s5381_s23 + $0x618] ss:$48 sps:$4 sm:$0xff]  }
 0x26b   : > { %3562 = vmatprep.subr.bf16.mxu1 %v4656_v49  ;;  %v4737_v49 = vld [vmem:[%s5381_s23 + $0x674] ss:$48 sps:$4 sm:$0xff]  }
 0x26d   : > { %3481 = vmatpush1.bf16.msra.mxu0 %v4651_v50  ;;  %v4740_v50 = vld [vmem:[%s5381_s23 + $0x67c] ss:$48 sps:$4 sm:$0xff]  }
 0x26e   : > { %3563 = vmatpush1.bf16.msra.mxu1 %v4654_v51  ;;  %3482 = vmatprep.subr.bf16.mxu0 %v4659_v52  ;;  %v4735_v51 = vld [vmem:[%s5381_s23 + $0x670] ss:$48 sps:$4 sm:$0xff]   ;;  %v4738_v52 = vld [vmem:[%s5381_s23 + $0x678] ss:$48 sps:$4 sm:$0xff]  }
 0x26f   : > { %3564 = vmatprep.subr.bf16.mxu1 %v4662_v53  ;;  %v4743_v53 = vld [vmem:[%s5381_s23 + $0x6d4] ss:$48 sps:$4 sm:$0xff]  }
 0x271   : > { %3483 = vmatpush1.bf16.msra.mxu0 %v4657_v54  ;;  %v4746_v54 = vld [vmem:[%s5381_s23 + $0x6dc] ss:$48 sps:$4 sm:$0xff]  }
 0x272   : > { %3565 = vmatpush1.bf16.msra.mxu1 %v4660_v55  ;;  %3484 = vmatprep.subr.bf16.mxu0 %v4665_v56  ;;  %v4741_v55 = vld [vmem:[%s5381_s23 + $0x6d0] ss:$48 sps:$4 sm:$0xff]   ;;  %v4744_v56 = vld [vmem:[%s5381_s23 + $0x6d8] ss:$48 sps:$4 sm:$0xff]  }
 0x273   : > { %3566 = vmatprep.subr.bf16.mxu1 %v4668_v57  ;;  %v4749_v57 = vld [vmem:[%s5381_s23 + $0x734] ss:$48 sps:$4 sm:$0xff]  }
 0x275   : > { %3485 = vmatpush1.bf16.msra.mxu0 %v4663_v58  ;;  %v4752_v58 = vld [vmem:[%s5381_s23 + $0x73c] ss:$48 sps:$4 sm:$0xff]  }
 0x276   : > { %3567 = vmatpush1.bf16.msra.mxu1 %v4666_v59  ;;  %3486 = vmatprep.subr.bf16.mxu0 %v4671_v60  ;;  %v4747_v59 = vld [vmem:[%s5381_s23 + $0x730] ss:$48 sps:$4 sm:$0xff]   ;;  %v4750_v60 = vld [vmem:[%s5381_s23 + $0x738] ss:$48 sps:$4 sm:$0xff]  }
 0x277   : > { %3568 = vmatprep.subr.bf16.mxu1 %v4674_v61  ;;  %v4755_v61 = vld [vmem:[%s5381_s23 + $0x794] ss:$48 sps:$4 sm:$0xff]  }
 0x279   : > { %3487 = vmatpush1.bf16.msra.mxu0 %v4669_v62  ;;  %v4758_v62 = vld [vmem:[%s5381_s23 + $0x79c] ss:$48 sps:$4 sm:$0xff]  }
 0x27a   : > { %3569 = vmatpush1.bf16.msra.mxu1 %v4672_v63  ;;  %3488 = vmatprep.subr.bf16.mxu0 %v4677_v0  ;;  %v4753_v63 = vld [vmem:[%s5381_s23 + $0x790] ss:$48 sps:$4 sm:$0xff]   ;;  %v4756_v0 = vld [vmem:[%s5381_s23 + $0x798] ss:$48 sps:$4 sm:$0xff]  }
 0x27b   : > { %3570 = vmatprep.subr.bf16.mxu1 %v4680_v1  ;;  %v4761_v1 = vld [vmem:[%s5381_s23 + $0x7f4] ss:$48 sps:$4 sm:$0xff]  }
 0x27d   : > { %3489 = vmatpush1.bf16.msra.mxu0 %v4675_v2  ;;  %v4764_v2 = vld [vmem:[%s5381_s23 + $0x7fc] ss:$48 sps:$4 sm:$0xff]  }
 0x27e   : > { %3571 = vmatpush1.bf16.msra.mxu1 %v4678_v3  ;;  %3490 = vmatprep.subr.bf16.mxu0 %v4683_v4  ;;  %v4759_v3 = vld [vmem:[%s5381_s23 + $0x7f0] ss:$48 sps:$4 sm:$0xff]   ;;  %v4762_v4 = vld [vmem:[%s5381_s23 + $0x7f8] ss:$48 sps:$4 sm:$0xff]  }
 0x27f   : > { %3572 = vmatprep.subr.bf16.mxu1 %v4686_v5  ;;  %v4767_v5 = vld [vmem:[%s5381_s23 + $0x854] ss:$48 sps:$4 sm:$0xff]  }
 0x281   : > { %3491 = vmatpush1.bf16.msra.mxu0 %v4681_v6  ;;  %v4770_v6 = vld [vmem:[%s5381_s23 + $0x85c] ss:$48 sps:$4 sm:$0xff]  }
 0x282   : > { %3573 = vmatpush1.bf16.msra.mxu1 %v4684_v7  ;;  %3492 = vmatprep.subr.bf16.mxu0 %v4689_v10  ;;  %v4765_v7 = vld [vmem:[%s5381_s23 + $0x850] ss:$48 sps:$4 sm:$0xff]   ;;  %v4768_v10 = vld [vmem:[%s5381_s23 + $0x858] ss:$48 sps:$4 sm:$0xff]  }
 0x283   : > { %3574 = vmatprep.subr.bf16.mxu1 %v4692_v8  ;;  %v4773_v8 = vld [vmem:[%s5381_s23 + $0x8b4] ss:$48 sps:$4 sm:$0xff]  }
 0x285   : > { %3493 = vmatpush1.bf16.msra.mxu0 %v4687_v12  ;;  %v4776_v12 = vld [vmem:[%s5381_s23 + $0x8bc] ss:$48 sps:$4 sm:$0xff]  }
 0x286   : > { %3575 = vmatpush1.bf16.msra.mxu1 %v4690_v13  ;;  %3494 = vmatprep.subr.bf16.mxu0 %v4695_v15  ;;  %v4771_v13 = vld [vmem:[%s5381_s23 + $0x8b0] ss:$48 sps:$4 sm:$0xff]   ;;  %v4774_v15 = vld [vmem:[%s5381_s23 + $0x8b8] ss:$48 sps:$4 sm:$0xff]  }
 0x287   : > { %3576 = vmatprep.subr.bf16.mxu1 %v4698_v16  ;;  %v4779_v16 = vld [vmem:[%s5381_s23 + $0x914] ss:$48 sps:$4 sm:$0xff]  }
 0x289   : > { %3495 = vmatpush1.bf16.msra.mxu0 %v4693_v17  ;;  %v4782_v17 = vld [vmem:[%s5381_s23 + $0x91c] ss:$48 sps:$4 sm:$0xff]  }
 0x28a   : > { %3577 = vmatpush1.bf16.msra.mxu1 %v4696_v18  ;;  %3496 = vmatprep.subr.bf16.mxu0 %v4701_v11  ;;  %v4777_v18 = vld [vmem:[%s5381_s23 + $0x910] ss:$48 sps:$4 sm:$0xff]   ;;  %v4780_v11 = vld [vmem:[%s5381_s23 + $0x918] ss:$48 sps:$4 sm:$0xff]  }
 0x28b   : > { %3578 = vmatprep.subr.bf16.mxu1 %v4704_v20  ;;  %v4785_v20 = vld [vmem:[%s5381_s23 + $0x974] ss:$48 sps:$4 sm:$0xff]  }
 0x28d   : > { %3497 = vmatpush1.bf16.msra.mxu0 %v4699_v23  ;;  %v4788_v23 = vld [vmem:[%s5381_s23 + $0x97c] ss:$48 sps:$4 sm:$0xff]  }
 0x28e   : > { %3579 = vmatpush1.bf16.msra.mxu1 %v4702_v25  ;;  %3498 = vmatprep.subr.bf16.mxu0 %v4707_v26  ;;  %v4783_v25 = vld [vmem:[%s5381_s23 + $0x970] ss:$48 sps:$4 sm:$0xff]   ;;  %v4786_v26 = vld [vmem:[%s5381_s23 + $0x978] ss:$48 sps:$4 sm:$0xff]  }
 0x28f   : > { %3580 = vmatprep.subr.bf16.mxu1 %v4710_v27  ;;  %v4791_v27 = vld [vmem:[%s5381_s23 + $0x9d4] ss:$48 sps:$4 sm:$0xff]  }
 0x291   : > { %3499 = vmatpush1.bf16.msra.mxu0 %v4705_v28  ;;  %v4794_v28 = vld [vmem:[%s5381_s23 + $0x9dc] ss:$48 sps:$4 sm:$0xff]  }
 0x292   : > { %3581 = vmatpush1.bf16.msra.mxu1 %v4708_v29  ;;  %3500 = vmatprep.subr.bf16.mxu0 %v4713_v30  ;;  %v4789_v29 = vld [vmem:[%s5381_s23 + $0x9d0] ss:$48 sps:$4 sm:$0xff]   ;;  %v4792_v30 = vld [vmem:[%s5381_s23 + $0x9d8] ss:$48 sps:$4 sm:$0xff]  }
 0x293   : > { %3582 = vmatprep.subr.bf16.mxu1 %v4716_v31  ;;  %v4797_v31 = vld [vmem:[%s5381_s23 + $0xa34] ss:$48 sps:$4 sm:$0xff]  }
 0x295   : > { %3501 = vmatpush1.bf16.msra.mxu0 %v4711_v32  ;;  %v4800_v32 = vld [vmem:[%s5381_s23 + $0xa3c] ss:$48 sps:$4 sm:$0xff]  }
 0x296   : > { %3583 = vmatpush1.bf16.msra.mxu1 %v4714_v33  ;;  %3502 = vmatprep.subr.bf16.mxu0 %v4719_v34  ;;  %v4795_v33 = vld [vmem:[%s5381_s23 + $0xa30] ss:$48 sps:$4 sm:$0xff]   ;;  %v4798_v34 = vld [vmem:[%s5381_s23 + $0xa38] ss:$48 sps:$4 sm:$0xff]  }
 0x297   : > { %3584 = vmatprep.subr.bf16.mxu1 %v4722_v35  ;;  %v4803_v35 = vld [vmem:[%s5381_s23 + $0xa94] ss:$48 sps:$4 sm:$0xff]  }
 0x299   : > { %3503 = vmatpush1.bf16.msra.mxu0 %v4717_v37  ;;  %v4806_v37 = vld [vmem:[%s5381_s23 + $0xa9c] ss:$48 sps:$4 sm:$0xff]  }
 0x29a   : > { %3585 = vmatpush1.bf16.msra.mxu1 %v4720_v38  ;;  %3504 = vmatprep.subr.bf16.mxu0 %v4725_v39  ;;  %v4801_v38 = vld [vmem:[%s5381_s23 + $0xa90] ss:$48 sps:$4 sm:$0xff]   ;;  %v4804_v39 = vld [vmem:[%s5381_s23 + $0xa98] ss:$48 sps:$4 sm:$0xff]  }
 0x29b   : > { %3586 = vmatprep.subr.bf16.mxu1 %v4728_v40  ;;  %v4809_v40 = vld [vmem:[%s5381_s23 + $0xaf4] ss:$48 sps:$4 sm:$0xff]  }
 0x29d   : > { %3505 = vmatpush1.bf16.msra.mxu0 %v4723_v9  ;;  %v4812_v9 = vld [vmem:[%s5381_s23 + $0xafc] ss:$48 sps:$4 sm:$0xff]  }
 0x29e   : > { %3587 = vmatpush1.bf16.msra.mxu1 %v4726_v41  ;;  %3515 = vmatprep.subr.bf16.mxu0 %v4731_v42  ;;  %v4807_v41 = vld [vmem:[%s5381_s23 + $0xaf0] ss:$48 sps:$4 sm:$0xff]   ;;  %v4810_v42 = vld [vmem:[%s5381_s23 + $0xaf8] ss:$48 sps:$4 sm:$0xff]  }
 0x29f   : > { %3597 = vmatprep.subr.bf16.mxu1 %v4734_v43  ;;  %v4815_v43 = vld [vmem:[%s5381_s23 + $0xb54] ss:$48 sps:$4 sm:$0xff]  }
 0x2a0   : > { %3507 = vmatmul.mubr.bf16.vlgmr.msra.gmra.mrb[8].mxu0 %v5510_v21 }
 0x2a1   : > { %3589 = vmatmul.mubr.bf16.vlgmr.msra.gmra.mrb[8].mxu1 %v5510_v21  ;;  %3516 = vmatpush1.bf16.msra.mxu0 %v4729_v45  ;;  %v4818_v45 = vld [vmem:[%s5381_s23 + $0xb5c] ss:$48 sps:$4 sm:$0xff]  }
 0x2a2   : > { %4302 = vmatprep.mubr.msk.bf16.mxu0 %vm823_vm3, %v5512_v14  ;;  %3598 = vmatpush1.bf16.msra.mxu1 %v4732_v48  ;;  %v1312_v48 = vld [vmem:[%s5381_s23 + $0xbb0] sm:$0x33] }
 0x2a3   : > { %4304 = vmatprep.mubr.msk.bf16.mxu1 %vm823_vm3, %v5512_v14  ;;  %3517 = vmatprep.subr.bf16.mxu0 %v4737_v49  ;;  %v1313_v49 = vld [vmem:[%s5381_s23 + $0xbb8] sm:$0x33] }
 0x2a4   : > { %3599 = vmatprep.subr.bf16.mxu1 %v4740_v50  ;;  %v4813_v50 = vld [vmem:[%s5381_s23 + $0xb50] ss:$48 sps:$4 sm:$0xff]  }
 0x2a5   : > { %3518 = vmatpush1.bf16.msra.mxu0 %v4735_v51  ;;  %v4816_v51 = vld [vmem:[%s5381_s23 + $0xb58] ss:$48 sps:$4 sm:$0xff]  }
 0x2a6   : > { %3600 = vmatpush1.bf16.msra.mxu1 %v4738_v52  ;;  %3519 = vmatprep.subr.bf16.mxu0 %v4743_v53  ;;  %v4290_v52 = vcombine.high %v1312_v48, %v1312_v48  ;;  %v4289_v53 = vcombine.low %v1312_v48, %v1312_v48  ;;  %v4889_v48 = vld [vmem:[%s5381_s23 + $0x440] ss:$48 sps:$4 sm:$0xff]  }
 0x2a7   : > { %3601 = vmatprep.subr.bf16.mxu1 %v4746_v54  ;;  %v4292_v54 = vcombine.high %v1313_v49, %v1313_v49 }
 0x2a9   : > { %3520 = vmatpush1.bf16.msra.mxu0 %v4741_v55  ;;  %v4291_v55 = vcombine.low %v1313_v49, %v1313_v49  ;;  %v4892_v49 = vld [vmem:[%s5381_s23 + $0x448] ss:$48 sps:$4 sm:$0xff]  }
 0x2aa   : > { %3602 = vmatpush1.bf16.msra.mxu1 %v4744_v56  ;;  %3521 = vmatprep.subr.bf16.mxu0 %v4749_v57  ;;  %v3287_v56 = vsel %vm3273_vm4, %v4289_v53, 0  ;;  %v4825_v57 = vld [vmem:[%s5381_s23 + $0x24] ss:$48 sps:$4 sm:$0xff]   ;;  %v4898_v53 = vld [vmem:[%s5381_s23 + $0x4a8] ss:$48 sps:$4 sm:$0xff]  }
 0x2ab   : > { %3603 = vmatprep.subr.bf16.mxu1 %v4752_v58  ;;  %v3293_v58 = vsel %vm3273_vm4, %v4291_v55, 0  ;;  %v4906_v55 = vld [vmem:[%s5381_s23 + $0x50c] ss:$48 sps:$4 sm:$0xff]  }
 0x2ad   : > { %3522 = vmatpush1.bf16.msra.mxu0 %v4747_v59  ;;  %v4828_v59 = vld [vmem:[%s5381_s23 + $0x2c] ss:$48 sps:$4 sm:$0xff]  }
 0x2ae   : > { %3604 = vmatpush1.bf16.msra.mxu1 %v4750_v60  ;;  %3523 = vmatprep.subr.bf16.mxu0 %v4755_v61  ;;  %v4823_v60 = vld [vmem:[%s5381_s23 + $0x20] ss:$48 sps:$4 sm:$0xff]   ;;  %v4826_v61 = vld [vmem:[%s5381_s23 + $0x28] ss:$48 sps:$4 sm:$0xff]  }
 0x2af   : > { %3605 = vmatprep.subr.bf16.mxu1 %v4758_v62  ;;  %v4831_v62 = vld [vmem:[%s5381_s23 + $0x84] ss:$48 sps:$4 sm:$0xff]  }
 0x2b1   : > { %3524 = vmatpush1.bf16.msra.mxu0 %v4753_v63  ;;  %v4834_v63 = vld [vmem:[%s5381_s23 + $0x8c] ss:$48 sps:$4 sm:$0xff]  }
 0x2b2   : > { %3606 = vmatpush1.bf16.msra.mxu1 %v4756_v0  ;;  %3525 = vmatprep.subr.bf16.mxu0 %v4761_v1  ;;  %v4829_v0 = vld [vmem:[%s5381_s23 + $0x80] ss:$48 sps:$4 sm:$0xff]   ;;  %v4832_v1 = vld [vmem:[%s5381_s23 + $0x88] ss:$48 sps:$4 sm:$0xff]  }
 0x2b3   : > { %3607 = vmatprep.subr.bf16.mxu1 %v4764_v2  ;;  %v4837_v2 = vld [vmem:[%s5381_s23 + $0xe4] ss:$48 sps:$4 sm:$0xff]  }
 0x2b5   : > { %3526 = vmatpush1.bf16.msra.mxu0 %v4759_v3  ;;  %v4840_v3 = vld [vmem:[%s5381_s23 + $0xec] ss:$48 sps:$4 sm:$0xff]  }
 0x2b6   : > { %3608 = vmatpush1.bf16.msra.mxu1 %v4762_v4  ;;  %3527 = vmatprep.subr.bf16.mxu0 %v4767_v5  ;;  %v4835_v4 = vld [vmem:[%s5381_s23 + $0xe0] ss:$48 sps:$4 sm:$0xff]   ;;  %v4838_v5 = vld [vmem:[%s5381_s23 + $0xe8] ss:$48 sps:$4 sm:$0xff]  }
 0x2b7   : > { %3609 = vmatprep.subr.bf16.mxu1 %v4770_v6  ;;  %v4843_v6 = vld [vmem:[%s5381_s23 + $0x144] ss:$48 sps:$4 sm:$0xff]  }
 0x2b9   : > { %3528 = vmatpush1.bf16.msra.mxu0 %v4765_v7  ;;  %v4846_v7 = vld [vmem:[%s5381_s23 + $0x14c] ss:$48 sps:$4 sm:$0xff]  }
 0x2ba   : > { %3610 = vmatpush1.bf16.msra.mxu1 %v4768_v10  ;;  %3529 = vmatprep.subr.bf16.mxu0 %v4773_v8  ;;  %v4844_v10 = vld [vmem:[%s5381_s23 + $0x148] ss:$48 sps:$4 sm:$0xff]   ;;  %v4849_v8 = vld [vmem:[%s5381_s23 + $0x1a4] ss:$48 sps:$4 sm:$0xff]  }
 0x2bb   : > { %3611 = vmatprep.subr.bf16.mxu1 %v4776_v12  ;;  %v4852_v12 = vld [vmem:[%s5381_s23 + $0x1ac] ss:$48 sps:$4 sm:$0xff]  }
 0x2bd   : > { %3530 = vmatpush1.bf16.msra.mxu0 %v4771_v13  ;;  %v4847_v13 = vld [vmem:[%s5381_s23 + $0x1a0] ss:$48 sps:$4 sm:$0xff]  }
 0x2be   : > { %3612 = vmatpush1.bf16.msra.mxu1 %v4774_v15  ;;  %3531 = vmatprep.subr.bf16.mxu0 %v4779_v16  ;;  %v4850_v15 = vld [vmem:[%s5381_s23 + $0x1a8] ss:$48 sps:$4 sm:$0xff]   ;;  %v4855_v16 = vld [vmem:[%s5381_s23 + $0x204] ss:$48 sps:$4 sm:$0xff]  }
 0x2bf   : > { %3613 = vmatprep.subr.bf16.mxu1 %v4782_v17  ;;  %v4858_v17 = vld [vmem:[%s5381_s23 + $0x20c] ss:$48 sps:$4 sm:$0xff]  }
 0x2c1   : > { %3532 = vmatpush1.bf16.msra.mxu0 %v4777_v18  ;;  %v4853_v18 = vld [vmem:[%s5381_s23 + $0x200] ss:$48 sps:$4 sm:$0xff]  }
 0x2c2   : > { %3614 = vmatpush1.bf16.msra.mxu1 %v4780_v11  ;;  %3533 = vmatprep.subr.bf16.mxu0 %v4785_v20  ;;  %v4856_v11 = vld [vmem:[%s5381_s23 + $0x208] ss:$48 sps:$4 sm:$0xff]   ;;  %v4861_v20 = vld [vmem:[%s5381_s23 + $0x264] ss:$48 sps:$4 sm:$0xff]  }
 0x2c3   : > { %3615 = vmatprep.subr.bf16.mxu1 %v4788_v23  ;;  %v4864_v23 = vld [vmem:[%s5381_s23 + $0x26c] ss:$48 sps:$4 sm:$0xff]  }
 0x2c5   : > { %3534 = vmatpush1.bf16.msra.mxu0 %v4783_v25  ;;  %v4859_v25 = vld [vmem:[%s5381_s23 + $0x260] ss:$48 sps:$4 sm:$0xff]  }
 0x2c6   : > { %3616 = vmatpush1.bf16.msra.mxu1 %v4786_v26  ;;  %3535 = vmatprep.subr.bf16.mxu0 %v4791_v27  ;;  %v4862_v26 = vld [vmem:[%s5381_s23 + $0x268] ss:$48 sps:$4 sm:$0xff]   ;;  %v4867_v27 = vld [vmem:[%s5381_s23 + $0x2c4] ss:$48 sps:$4 sm:$0xff]  }
 0x2c7   : > { %3617 = vmatprep.subr.bf16.mxu1 %v4794_v28  ;;  %v4870_v28 = vld [vmem:[%s5381_s23 + $0x2cc] ss:$48 sps:$4 sm:$0xff]  }
 0x2c9   : > { %3536 = vmatpush1.bf16.msra.mxu0 %v4789_v29  ;;  %v4865_v29 = vld [vmem:[%s5381_s23 + $0x2c0] ss:$48 sps:$4 sm:$0xff]  }
 0x2ca   : > { %3618 = vmatpush1.bf16.msra.mxu1 %v4792_v30  ;;  %3537 = vmatprep.subr.bf16.mxu0 %v4797_v31  ;;  %v4868_v30 = vld [vmem:[%s5381_s23 + $0x2c8] ss:$48 sps:$4 sm:$0xff]   ;;  %v4873_v31 = vld [vmem:[%s5381_s23 + $0x324] ss:$48 sps:$4 sm:$0xff]  }
 0x2cb   : > { %3619 = vmatprep.subr.bf16.mxu1 %v4800_v32  ;;  %v4876_v32 = vld [vmem:[%s5381_s23 + $0x32c] ss:$48 sps:$4 sm:$0xff]  }
 0x2cd   : > { %3538 = vmatpush1.bf16.msra.mxu0 %v4795_v33  ;;  %v4871_v33 = vld [vmem:[%s5381_s23 + $0x320] ss:$48 sps:$4 sm:$0xff]  }
 0x2ce   : > { %3620 = vmatpush1.bf16.msra.mxu1 %v4798_v34  ;;  %3539 = vmatprep.subr.bf16.mxu0 %v4803_v35  ;;  %v4874_v34 = vld [vmem:[%s5381_s23 + $0x328] ss:$48 sps:$4 sm:$0xff]   ;;  %v4879_v35 = vld [vmem:[%s5381_s23 + $0x384] ss:$48 sps:$4 sm:$0xff]  }
 0x2cf   : > { %3621 = vmatprep.subr.bf16.mxu1 %v4806_v37  ;;  %v4882_v37 = vld [vmem:[%s5381_s23 + $0x38c] ss:$48 sps:$4 sm:$0xff]  }
 0x2d1   : > { %3540 = vmatpush1.bf16.msra.mxu0 %v4801_v38  ;;  %v4877_v38 = vld [vmem:[%s5381_s23 + $0x380] ss:$48 sps:$4 sm:$0xff]  }
 0x2d2   : > { %3622 = vmatpush1.bf16.msra.mxu1 %v4804_v39  ;;  %3541 = vmatprep.subr.bf16.mxu0 %v4809_v40  ;;  %v4880_v39 = vld [vmem:[%s5381_s23 + $0x388] ss:$48 sps:$4 sm:$0xff]   ;;  %v4885_v40 = vld [vmem:[%s5381_s23 + $0x3e4] ss:$48 sps:$4 sm:$0xff]  }
 0x2d3   : > { %3623 = vmatprep.subr.bf16.mxu1 %v4812_v9  ;;  %v4888_v9 = vld [vmem:[%s5381_s23 + $0x3ec] ss:$48 sps:$4 sm:$0xff]  }
 0x2d5   : > { %3542 = vmatpush1.bf16.msra.mxu0 %v4807_v41  ;;  %v4883_v41 = vld [vmem:[%s5381_s23 + $0x3e0] ss:$48 sps:$4 sm:$0xff]  }
 0x2d6   : > { %3624 = vmatpush1.bf16.msra.mxu1 %v4810_v42  ;;  %3543 = vmatprep.subr.bf16.mxu0 %v4815_v43  ;;  %v4886_v42 = vld [vmem:[%s5381_s23 + $0x3e8] ss:$48 sps:$4 sm:$0xff]   ;;  %v4891_v43 = vld [vmem:[%s5381_s23 + $0x444] ss:$48 sps:$4 sm:$0xff]  }
 0x2d7   : > { %3625 = vmatprep.subr.bf16.mxu1 %v4818_v45  ;;  %v4894_v45 = vld [vmem:[%s5381_s23 + $0x44c] ss:$48 sps:$4 sm:$0xff]  }
 0x2d9   : > { %3544 = vmatpush1.bf16.msra.mxu0 %v4813_v50  ;;  %v4897_v50 = vld [vmem:[%s5381_s23 + $0x4a4] ss:$48 sps:$4 sm:$0xff]  }
 0x2da   : > { %3626 = vmatpush1.bf16.msra.mxu1 %v4816_v51  ;;  %4301 = vmatprep.subr.msk.bf16.mxu0 %vm3273_vm4, %v4290_v52  ;;  %v4900_v51 = vld [vmem:[%s5381_s23 + $0x4ac] ss:$48 sps:$4 sm:$0xff]   ;;  %v4895_v52 = vld [vmem:[%s5381_s23 + $0x4a0] ss:$48 sps:$4 sm:$0xff]  }
 0x2db   : > { %4303 = vmatprep.subr.msk.bf16.mxu1 %vm3273_vm4, %v4292_v54  ;;  %v4903_v54 = vld [vmem:[%s5381_s23 + $0x504] ss:$48 sps:$4 sm:$0xff]  }
 0x2dd   : > { %3546 = vmatpush1.bf16.msra.mxu0 %v3287_v56  ;;  %v4901_v56 = vld [vmem:[%s5381_s23 + $0x500] ss:$48 sps:$4 sm:$0xff]  }
 0x2de   : > { %3628 = vmatpush1.bf16.msra.mxu1 %v3293_v58  ;;  %3638 = vmatprep.subr.bf16.mxu0 %v4825_v57  ;;  %v4904_v57 = vld [vmem:[%s5381_s23 + $0x508] ss:$48 sps:$4 sm:$0xff]   ;;  %v4909_v58 = vld [vmem:[%s5381_s23 + $0x564] ss:$48 sps:$4 sm:$0xff]  }
 0x2df   : > { %3720 = vmatprep.subr.bf16.mxu1 %v4828_v59  ;;  %v4912_v59 = vld [vmem:[%s5381_s23 + $0x56c] ss:$48 sps:$4 sm:$0xff]  }
 0x2e0   : > { %3548 = vmatmul.mubr.bf16.vlgmr.msra.gmra.mrb[8].mxu0 %v5589_v36 }
 0x2e1   : > { %3630 = vmatmul.mubr.bf16.vlgmr.msra.gmra.mrb[8].mxu1 %v5589_v36  ;;  %3639 = vmatpush1.bf16.msra.mxu0 %v4823_v60  ;;  %v4907_v60 = vld [vmem:[%s5381_s23 + $0x560] ss:$48 sps:$4 sm:$0xff]  }
 0x2e2   : > { %3670 = vmatprep.mubr.bf16.mxu0 %v5506_v19  ;;  %3721 = vmatpush1.bf16.msra.mxu1 %v4826_v61  ;;  %v4910_v61 = vld [vmem:[%s5381_s23 + $0x568] ss:$48 sps:$4 sm:$0xff]  }
 0x2e3   : > { %3752 = vmatprep.mubr.bf16.mxu1 %v5506_v19  ;;  %3640 = vmatprep.subr.bf16.mxu0 %v4831_v62  ;;  %v4841_v19 = vld [vmem:[%s5381_s23 + $0x140] ss:$48 sps:$4 sm:$0xff]   ;;  %v4915_v62 = vld [vmem:[%s5381_s23 + $0x5c4] ss:$48 sps:$4 sm:$0xff]  }
 0x2e4   : > { %3722 = vmatprep.subr.bf16.mxu1 %v4834_v63  ;;  %v4918_v63 = vld [vmem:[%s5381_s23 + $0x5cc] ss:$48 sps:$4 sm:$0xff]  }
 0x2e5   : > { %3641 = vmatpush1.bf16.msra.mxu0 %v4829_v0  ;;  %v4913_v0 = vld [vmem:[%s5381_s23 + $0x5c0] ss:$48 sps:$4 sm:$0xff]  }
 0x2e6   : > { %3723 = vmatpush1.bf16.msra.mxu1 %v4832_v1  ;;  %3642 = vmatprep.subr.bf16.mxu0 %v4837_v2  ;;  %v4916_v1 = vld [vmem:[%s5381_s23 + $0x5c8] ss:$48 sps:$4 sm:$0xff]   ;;  %v4921_v2 = vld [vmem:[%s5381_s23 + $0x624] ss:$48 sps:$4 sm:$0xff]  }
 0x2e7   : > { %3724 = vmatprep.subr.bf16.mxu1 %v4840_v3  ;;  %v4924_v3 = vld [vmem:[%s5381_s23 + $0x62c] ss:$48 sps:$4 sm:$0xff]  }
 0x2e9   : > { %3643 = vmatpush1.bf16.msra.mxu0 %v4835_v4  ;;  %v4919_v4 = vld [vmem:[%s5381_s23 + $0x620] ss:$48 sps:$4 sm:$0xff]  }
 0x2ea   : > { %3725 = vmatpush1.bf16.msra.mxu1 %v4838_v5  ;;  %3644 = vmatprep.subr.bf16.mxu0 %v4843_v6  ;;  %v4922_v5 = vld [vmem:[%s5381_s23 + $0x628] ss:$48 sps:$4 sm:$0xff]   ;;  %v4927_v6 = vld [vmem:[%s5381_s23 + $0x684] ss:$48 sps:$4 sm:$0xff]  }
 0x2eb   : > { %3726 = vmatprep.subr.bf16.mxu1 %v4846_v7  ;;  %v4930_v7 = vld [vmem:[%s5381_s23 + $0x68c] ss:$48 sps:$4 sm:$0xff]  }
 0x2ed   : > { %3645 = vmatpush1.bf16.msra.mxu0 %v4841_v19  ;;  %v4925_v19 = vld [vmem:[%s5381_s23 + $0x680] ss:$48 sps:$4 sm:$0xff]  }
 0x2ee   : > { %3727 = vmatpush1.bf16.msra.mxu1 %v4844_v10  ;;  %3646 = vmatprep.subr.bf16.mxu0 %v4849_v8  ;;  %v4928_v10 = vld [vmem:[%s5381_s23 + $0x688] ss:$48 sps:$4 sm:$0xff]   ;;  %v4933_v8 = vld [vmem:[%s5381_s23 + $0x6e4] ss:$48 sps:$4 sm:$0xff]  }
 0x2ef   : > { %3728 = vmatprep.subr.bf16.mxu1 %v4852_v12  ;;  %v4936_v12 = vld [vmem:[%s5381_s23 + $0x6ec] ss:$48 sps:$4 sm:$0xff]  }
 0x2f1   : > { %3647 = vmatpush1.bf16.msra.mxu0 %v4847_v13  ;;  %v4934_v13 = vld [vmem:[%s5381_s23 + $0x6e8] ss:$48 sps:$4 sm:$0xff]  }
 0x2f2   : > { %3729 = vmatpush1.bf16.msra.mxu1 %v4850_v15  ;;  %3648 = vmatprep.subr.bf16.mxu0 %v4855_v16  ;;  %v4939_v15 = vld [vmem:[%s5381_s23 + $0x744] ss:$48 sps:$4 sm:$0xff]   ;;  %v4942_v16 = vld [vmem:[%s5381_s23 + $0x74c] ss:$48 sps:$4 sm:$0xff]  }
 0x2f3   : > { %3730 = vmatprep.subr.bf16.mxu1 %v4858_v17  ;;  %v4940_v17 = vld [vmem:[%s5381_s23 + $0x748] ss:$48 sps:$4 sm:$0xff]  }
 0x2f5   : > { %3649 = vmatpush1.bf16.msra.mxu0 %v4853_v18  ;;  %v4945_v18 = vld [vmem:[%s5381_s23 + $0x7a4] ss:$48 sps:$4 sm:$0xff]  }
 0x2f6   : > { %3731 = vmatpush1.bf16.msra.mxu1 %v4856_v11  ;;  %3650 = vmatprep.subr.bf16.mxu0 %v4861_v20  ;;  %v4948_v11 = vld [vmem:[%s5381_s23 + $0x7ac] ss:$48 sps:$4 sm:$0xff]   ;;  %v4943_v20 = vld [vmem:[%s5381_s23 + $0x7a0] ss:$48 sps:$4 sm:$0xff]  }
 0x2f7   : > { %3732 = vmatprep.subr.bf16.mxu1 %v4864_v23  ;;  %v5829_v23 = vld [vmem:[%s5823_s15] sm:$0xff] }
 0x2f9   : > { %3651 = vmatpush1.bf16.msra.mxu0 %v4859_v25  ;;  %v4946_v25 = vld [vmem:[%s5381_s23 + $0x7a8] ss:$48 sps:$4 sm:$0xff]  }
 0x2fa   : > { %3733 = vmatpush1.bf16.msra.mxu1 %v4862_v26  ;;  %3652 = vmatprep.subr.bf16.mxu0 %v4867_v27  ;;  %v4951_v26 = vld [vmem:[%s5381_s23 + $0x804] ss:$48 sps:$4 sm:$0xff]   ;;  %v4954_v27 = vld [vmem:[%s5381_s23 + $0x80c] ss:$48 sps:$4 sm:$0xff]  }
 0x2fb   : > { %3734 = vmatprep.subr.bf16.mxu1 %v4870_v28  ;;  %v1323_v28 = vrot.slane %v5829_v23, %v5391_v46 }
 0x2fd   : > { %3653 = vmatpush1.bf16.msra.mxu0 %v4865_v29  ;;  %v1331_v29 = vrot.slane %v5829_v23, %v5476_v22 }
 0x2fe   : > { %3735 = vmatpush1.bf16.msra.mxu1 %v4868_v30  ;;  %3654 = vmatprep.subr.bf16.mxu0 %v4873_v31  ;;  %v1327_v30 = vrot.slane %v5829_v23, %v5394_v47  ;;  %v1335_v31 = vrot.slane %v5829_v23, %v5482_v24 }
 0x2ff   : > { %3736 = vmatprep.subr.bf16.mxu1 %v4876_v32  ;;  %v4949_v32 = vld [vmem:[%s5381_s23 + $0x800] ss:$48 sps:$4 sm:$0xff]  }
 0x301   : > { %3655 = vmatpush1.bf16.msra.mxu0 %v4871_v33  ;;  %v4952_v33 = vld [vmem:[%s5381_s23 + $0x808] ss:$48 sps:$4 sm:$0xff]  }
 0x302   : > { %3737 = vmatpush1.bf16.msra.mxu1 %v4874_v34  ;;  %3656 = vmatprep.subr.bf16.mxu0 %v4879_v35  ;;  %v4957_v34 = vld [vmem:[%s5381_s23 + $0x864] ss:$48 sps:$4 sm:$0xff]  }
 0x303   : > { %3738 = vmatprep.subr.bf16.mxu1 %v4882_v37 }
 0x305   : > { %3657 = vmatpush1.bf16.msra.mxu0 %v4877_v38  ;;  %v4960_v38 = vld [vmem:[%s5381_s23 + $0x86c] ss:$48 sps:$4 sm:$0xff]  }
 0x306   : > { %3739 = vmatpush1.bf16.msra.mxu1 %v4880_v39  ;;  %3658 = vmatprep.subr.bf16.mxu0 %v4885_v40 }
 0x307   : > { %3740 = vmatprep.subr.bf16.mxu1 %v4888_v9 }
 0x309   : > { %3659 = vmatpush1.bf16.msra.mxu0 %v4883_v41 }
 0x30a   : > { %3741 = vmatpush1.bf16.msra.mxu1 %v4886_v42  ;;  %3660 = vmatprep.subr.bf16.mxu0 %v4891_v43 }
 0x30b   : > { %3742 = vmatprep.subr.bf16.mxu1 %v4894_v45 }
 0x30d   : > { %3661 = vmatpush1.bf16.msra.mxu0 %v4889_v48 }
 0x30e   : > { %3743 = vmatpush1.bf16.msra.mxu1 %v4892_v49  ;;  %3662 = vmatprep.subr.bf16.mxu0 %v4897_v50  ;;  %v4955_v49 = vld [vmem:[%s5381_s23 + $0x860] ss:$48 sps:$4 sm:$0xff]  }
 0x30f   : > { %3744 = vmatprep.subr.bf16.mxu1 %v4900_v51 }
 0x311   : > { %3663 = vmatpush1.bf16.msra.mxu0 %v4895_v52  ;;  %v4958_v52 = vld [vmem:[%s5381_s23 + $0x868] ss:$48 sps:$4 sm:$0xff]  }
 0x312   : > { %3745 = vmatpush1.bf16.msra.mxu1 %v4898_v53  ;;  %3664 = vmatprep.subr.bf16.mxu0 %v4903_v54  ;;  %v4963_v53 = vld [vmem:[%s5381_s23 + $0x8c4] ss:$48 sps:$4 sm:$0xff]   ;;  %v4966_v54 = vld [vmem:[%s5381_s23 + $0x8cc] ss:$48 sps:$4 sm:$0xff]  }
 0x313   : > { %3746 = vmatprep.subr.bf16.mxu1 %v4906_v55  ;;  %v4961_v55 = vld [vmem:[%s5381_s23 + $0x8c0] ss:$48 sps:$4 sm:$0xff]  }
 0x315   : > { %3665 = vmatpush1.bf16.msra.mxu0 %v4901_v56  ;;  %v4964_v56 = vld [vmem:[%s5381_s23 + $0x8c8] ss:$48 sps:$4 sm:$0xff]  }
 0x316   : > { %3747 = vmatpush1.bf16.msra.mxu1 %v4904_v57  ;;  %3666 = vmatprep.subr.bf16.mxu0 %v4909_v58  ;;  %v4969_v57 = vld [vmem:[%s5381_s23 + $0x924] ss:$48 sps:$4 sm:$0xff]   ;;  %v4972_v58 = vld [vmem:[%s5381_s23 + $0x92c] ss:$48 sps:$4 sm:$0xff]  }
 0x317   : > { %3748 = vmatprep.subr.bf16.mxu1 %v4912_v59  ;;  %v4967_v59 = vld [vmem:[%s5381_s23 + $0x920] ss:$48 sps:$4 sm:$0xff]  }
 0x319   : > { %3667 = vmatpush1.bf16.msra.mxu0 %v4907_v60  ;;  %v4970_v60 = vld [vmem:[%s5381_s23 + $0x928] ss:$48 sps:$4 sm:$0xff]  }
 0x31a   : > { %3749 = vmatpush1.bf16.msra.mxu1 %v4910_v61  ;;  %3668 = vmatprep.subr.bf16.mxu0 %v4915_v62  ;;  %v4975_v61 = vld [vmem:[%s5381_s23 + $0x984] ss:$48 sps:$4 sm:$0xff]   ;;  %v4978_v62 = vld [vmem:[%s5381_s23 + $0x98c] ss:$48 sps:$4 sm:$0xff]  }
 0x31b   : > { %3750 = vmatprep.subr.bf16.mxu1 %v4918_v63  ;;  %v4973_v63 = vld [vmem:[%s5381_s23 + $0x980] ss:$48 sps:$4 sm:$0xff]  }
 0x31d   : > { %3669 = vmatpush1.bf16.msra.mxu0 %v4913_v0  ;;  %v4976_v0 = vld [vmem:[%s5381_s23 + $0x988] ss:$48 sps:$4 sm:$0xff]  }
 0x31e   : > { %3751 = vmatpush1.bf16.msra.mxu1 %v4916_v1  ;;  %3679 = vmatprep.subr.bf16.mxu0 %v4921_v2  ;;  %v4981_v1 = vld [vmem:[%s5381_s23 + $0x9e4] ss:$48 sps:$4 sm:$0xff]   ;;  %v4984_v2 = vld [vmem:[%s5381_s23 + $0x9ec] ss:$48 sps:$4 sm:$0xff]  }
 0x31f   : > { %3761 = vmatprep.subr.bf16.mxu1 %v4924_v3  ;;  %v4979_v3 = vld [vmem:[%s5381_s23 + $0x9e0] ss:$48 sps:$4 sm:$0xff]  }
 0x320   : > { %3671 = vmatmul.mubr.bf16.vlgmr.msra.gmra.mrb[12].mxu0 %v5510_v21 }
 0x321   : > { %3753 = vmatmul.mubr.bf16.vlgmr.msra.gmra.mrb[12].mxu1 %v5510_v21  ;;  %3680 = vmatpush1.bf16.msra.mxu0 %v4919_v4  ;;  %v4931_v21 = vld [vmem:[%s5381_s23 + $0x6e0] ss:$48 sps:$4 sm:$0xff]   ;;  %v4982_v4 = vld [vmem:[%s5381_s23 + $0x9e8] ss:$48 sps:$4 sm:$0xff]  }
 0x322   : > { %4306 = vmatprep.mubr.msk.bf16.mxu0 %vm823_vm3, %v5512_v14  ;;  %3762 = vmatpush1.bf16.msra.mxu1 %v4922_v5  ;;  %v4987_v5 = vld [vmem:[%s5381_s23 + $0xa44] ss:$48 sps:$4 sm:$0xff]  }
 0x323   : > { %4308 = vmatprep.mubr.msk.bf16.mxu1 %vm823_vm3, %v5512_v14  ;;  %3681 = vmatprep.subr.bf16.mxu0 %v4927_v6  ;;  %v4937_v14 = vld [vmem:[%s5381_s23 + $0x740] ss:$48 sps:$4 sm:$0xff]   ;;  %v4990_v6 = vld [vmem:[%s5381_s23 + $0xa4c] ss:$48 sps:$4 sm:$0xff]  }
 0x324   : > { %3763 = vmatprep.subr.bf16.mxu1 %v4930_v7  ;;  %v4985_v7 = vld [vmem:[%s5381_s23 + $0xa40] ss:$48 sps:$4 sm:$0xff]  }
 0x325   : > { %3682 = vmatpush1.bf16.msra.mxu0 %v4925_v19  ;;  %v4988_v19 = vld [vmem:[%s5381_s23 + $0xa48] ss:$48 sps:$4 sm:$0xff]  }
 0x326   : > { %3764 = vmatpush1.bf16.msra.mxu1 %v4928_v10  ;;  %3683 = vmatprep.subr.bf16.mxu0 %v4933_v8  ;;  %v4993_v10 = vld [vmem:[%s5381_s23 + $0xaa4] ss:$48 sps:$4 sm:$0xff]   ;;  %v4996_v8 = vld [vmem:[%s5381_s23 + $0xaac] ss:$48 sps:$4 sm:$0xff]  }
 0x327   : > { %3765 = vmatprep.subr.bf16.mxu1 %v4936_v12  ;;  %v4991_v12 = vld [vmem:[%s5381_s23 + $0xaa0] ss:$48 sps:$4 sm:$0xff]  }
 0x329   : > { %3684 = vmatpush1.bf16.msra.mxu0 %v4931_v21  ;;  %v4994_v21 = vld [vmem:[%s5381_s23 + $0xaa8] ss:$48 sps:$4 sm:$0xff]  }
 0x32a   : > { %3766 = vmatpush1.bf16.msra.mxu1 %v4934_v13  ;;  %3685 = vmatprep.subr.bf16.mxu0 %v4939_v15  ;;  %v4999_v13 = vld [vmem:[%s5381_s23 + $0xb04] ss:$48 sps:$4 sm:$0xff]   ;;  %v5002_v15 = vld [vmem:[%s5381_s23 + $0xb0c] ss:$48 sps:$4 sm:$0xff]  }
 0x32b   : > { %3767 = vmatprep.subr.bf16.mxu1 %v4942_v16  ;;  %v4997_v16 = vld [vmem:[%s5381_s23 + $0xb00] ss:$48 sps:$4 sm:$0xff]  }
 0x32d   : > { %3686 = vmatpush1.bf16.msra.mxu0 %v4937_v14  ;;  %v5000_v14 = vld [vmem:[%s5381_s23 + $0xb08] ss:$48 sps:$4 sm:$0xff]  }
 0x32e   : > { %3768 = vmatpush1.bf16.msra.mxu1 %v4940_v17  ;;  %3687 = vmatprep.subr.bf16.mxu0 %v4945_v18  ;;  %v5005_v17 = vld [vmem:[%s5381_s23 + $0xb64] ss:$48 sps:$4 sm:$0xff]   ;;  %v5008_v18 = vld [vmem:[%s5381_s23 + $0xb6c] ss:$48 sps:$4 sm:$0xff]  }
 0x32f   : > { %3769 = vmatprep.subr.bf16.mxu1 %v4948_v11  ;;  %v1314_v11 = vld [vmem:[%s5381_s23 + $0xbc0] sm:$0x33] }
 0x331   : > { %3688 = vmatpush1.bf16.msra.mxu0 %v4943_v20  ;;  %v1315_v20 = vld [vmem:[%s5381_s23 + $0xbc8] sm:$0x33] }
 0x332   : > { %3770 = vmatpush1.bf16.msra.mxu1 %v4946_v25  ;;  %3689 = vmatprep.subr.bf16.mxu0 %v4951_v26  ;;  %v5003_v25 = vld [vmem:[%s5381_s23 + $0xb60] ss:$48 sps:$4 sm:$0xff]   ;;  %v5006_v26 = vld [vmem:[%s5381_s23 + $0xb68] ss:$48 sps:$4 sm:$0xff]   ;;  %s4312_s23 = smul.u32 1536, %s5184_s29 }
 0x333   : > { %v3385_v35 = vpop.f32.mrb[4].mxu0  ;;  %v3467_v37 = vpop.f32.mrb[4].mxu1  ;;  %3771 = vmatprep.subr.bf16.mxu1 %v4954_v27  ;;  %v4294_v27 = vcombine.high %v1314_v11, %v1314_v11 }
 0x334   : > { %v4361_v39 = vadd.f32 %v3385_v35, %v1323_v28  ;;  %v4363_v40 = vadd.f32 %v3467_v37, %v1331_v29  ;;  %v3387_v9 = vpop.f32.mrb[5].mxu0  ;;  %v3469_v41 = vpop.f32.mrb[5].mxu1  ;;  %v4293_v28 = vcombine.low %v1314_v11, %v1314_v11  ;;  %v4296_v29 = vcombine.high %v1315_v20, %v1315_v20  ;;  %s5919_s1 = scalar_lea.hbm %s5979_s13, %s4312_s23 }
 0x335   : > { %v4362_v42 = vadd.f32 %v3387_v9, %v1327_v30  ;;  %v4364_v43 = vadd.f32 %v3469_v41, %v1335_v31  ;;  %v3389_v45 = vpop.f32.mrb[6].mxu0  ;;  %v3471_v48 = vpop.f32.mrb[6].mxu1  ;;  %3690 = vmatpush1.bf16.msra.mxu0 %v4949_v32  ;;  %v4295_v30 = vcombine.low %v1315_v20, %v1315_v20  ;;  %v1342_v35 = vsub.s32 5, %v5385_v44 }
 0x336   : > { %3802 = vst [vmem:[%s5849_s21] sm:$0xff] %v4361_v39  ;;  %3804 = vst [vmem:[%s5849_s21 + $0x10] sm:$0xff] %v4363_v40  ;;  %3772 = vmatpush1.bf16.msra.mxu1 %v4952_v33  ;;  %v3390_v50 = vpop.f32.mrb[7].mxu0  ;;  %v3472_v51 = vpop.f32.mrb[7].mxu1  ;;  %3691 = vmatprep.subr.bf16.mxu0 %v4957_v34  ;;  %v3299_v31 = vsel %vm3273_vm4, %v4293_v28, 0  ;;  %v1338_v33 = vsub.s32 4, %v5385_v44  ;;  %v1346_v34 = vsub.s32 6, %v5385_v44 }
 0x337   : > { %3803 = vst [vmem:[%s5849_s21 + $0x8] sm:$0xff] %v4362_v42  ;;  %3805 = vst [vmem:[%s5849_s21 + $0x18] sm:$0xff] %v4364_v43  ;;  %3773 = vmatprep.subr.bf16.mxu1 %v4960_v38  ;;  %v3305_v32 = vsel %vm3273_vm4, %v4295_v30, 0  ;;  %v1350_v37 = vsub.s32 7, %v5385_v44  ;;  %v1343_v40 = vrot.slane %v5829_v23, %v1342_v35 }
 0x338   : > { %v1339_v38 = vrot.slane %v5829_v23, %v1338_v33  ;;  %v1347_v39 = vrot.slane %v5829_v23, %v1346_v34 }
 0x339   : > { %3692 = vmatpush1.bf16.msra.mxu0 %v4955_v49  ;;  %v1351_v9 = vrot.slane %v5829_v23, %v1350_v37  ;;  %v1317_v23 = vld [vmem:[%s5823_s15 + $0x8] sm:$0xf]  ;;  %s5031_s15 = scalar_lea.vmem %s5030_s17, 3072 }
 0x33a   : > { %3774 = vmatpush1.bf16.msra.mxu1 %v4958_v52  ;;  %3693 = vmatprep.subr.bf16.mxu0 %v4963_v53  ;;  %p5033_p2 = scmp.lt.s32.totalorder %s5031_s15, %s5025_s24 }
 0x33b   : > { %3775 = vmatprep.subr.bf16.mxu1 %v4966_v54  ;;  %v1355_v54 = vrot.slane %v1317_v23, %v5391_v46 }
 0x33c   : > { %p5034_p3 = por %p5033_p2, %p5032_p1 }
 0x33d   : > { %3694 = vmatpush1.bf16.msra.mxu0 %v4961_v55  ;;  %v1363_v55 = vrot.slane %v1317_v23, %v5476_v22 }
 0x33e   : > { %3776 = vmatpush1.bf16.msra.mxu1 %v4964_v56  ;;  %3695 = vmatprep.subr.bf16.mxu0 %v4969_v57  ;;  %v1359_v56 = vrot.slane %v1317_v23, %v5394_v47  ;;  %v1367_v57 = vrot.slane %v1317_v23, %v5482_v24  ;;  %p5035_p4 = pnand %p5034_p3, %p5028_p0 }
 0x33f   : > { %3777 = vmatprep.subr.bf16.mxu1 %v4972_v58 }
 0x341   : > { %3696 = vmatpush1.bf16.msra.mxu0 %v4967_v59 }
 0x342   : > { %3778 = vmatpush1.bf16.msra.mxu1 %v4970_v60  ;;  %3697 = vmatprep.subr.bf16.mxu0 %v4975_v61 }
 0x343   : > { %3779 = vmatprep.subr.bf16.mxu1 %v4978_v62 }
 0x345   : > { %3698 = vmatpush1.bf16.msra.mxu0 %v4973_v63 }
 0x346   : > { %3780 = vmatpush1.bf16.msra.mxu1 %v4976_v0  ;;  %3699 = vmatprep.subr.bf16.mxu0 %v4981_v1 }
 0x347   : > { %3781 = vmatprep.subr.bf16.mxu1 %v4984_v2 }
 0x349   : > { %3700 = vmatpush1.bf16.msra.mxu0 %v4979_v3 }
 0x34a   : > { %3782 = vmatpush1.bf16.msra.mxu1 %v4982_v4  ;;  %3701 = vmatprep.subr.bf16.mxu0 %v4987_v5 }
 0x34b   : > { %3783 = vmatprep.subr.bf16.mxu1 %v4990_v6 }
 0x34d   : > { %3702 = vmatpush1.bf16.msra.mxu0 %v4985_v7 }
 0x34e   : > { %3784 = vmatpush1.bf16.msra.mxu1 %v4988_v19  ;;  %3703 = vmatprep.subr.bf16.mxu0 %v4993_v10 }
 0x34f   : > { %3785 = vmatprep.subr.bf16.mxu1 %v4996_v8 }
 0x351   : > { %3704 = vmatpush1.bf16.msra.mxu0 %v4991_v12 }
 0x352   : > { %3786 = vmatpush1.bf16.msra.mxu1 %v4994_v21  ;;  %3705 = vmatprep.subr.bf16.mxu0 %v4999_v13 }
 0x353   : > { %3787 = vmatprep.subr.bf16.mxu1 %v5002_v15 }
 0x355   : > { %3706 = vmatpush1.bf16.msra.mxu0 %v4997_v16 }
 0x356   : > { %3788 = vmatpush1.bf16.msra.mxu1 %v5000_v14  ;;  %3707 = vmatprep.subr.bf16.mxu0 %v5005_v17 }
 0x357   : > { %3789 = vmatprep.subr.bf16.mxu1 %v5008_v18 }
 0x359   : > { %3708 = vmatpush1.bf16.msra.mxu0 %v5003_v25 }
 0x35a   : > { %3790 = vmatpush1.bf16.msra.mxu1 %v5006_v26  ;;  %4305 = vmatprep.subr.msk.bf16.mxu0 %vm3273_vm4, %v4294_v27 }
 0x35b   : > { %4307 = vmatprep.subr.msk.bf16.mxu1 %vm3273_vm4, %v4296_v29 }
 0x35d   : > { %3710 = vmatpush1.bf16.msra.mxu0 %v3299_v31 }
 0x35e   : > { %3792 = vmatpush1.bf16.msra.mxu1 %v3305_v32 }
 0x360   : > { %3712 = vmatmul.mubr.bf16.vlgmr.msra.gmra.mrb[12].mxu0 %v5589_v36 }
 0x361   : > { %3794 = vmatmul.mubr.bf16.vlgmr.msra.gmra.mrb[12].mxu1 %v5589_v36 }
 0x3b3   : > { %v3549_v36 = vpop.f32.mrb[8].mxu0 }
 0x3b4   : > { %v4365_v41 = vadd.f32 %v3549_v36, %v1339_v38  ;;  %v3631_v42 = vpop.f32.mrb[8].mxu1  ;;  %v3551_v43 = vpop.f32.mrb[9].mxu0 }
 0x3b5   : > { %v4367_v45 = vadd.f32 %v3631_v42, %v1347_v39  ;;  %v4366_v48 = vadd.f32 %v3551_v43, %v1343_v40  ;;  %v3633_v44 = vpop.f32.mrb[9].mxu1  ;;  %v3553_v49 = vpop.f32.mrb[10].mxu0 }
 0x3b6   : > { %3806 = vst [vmem:[%s5849_s21 + $0x20] sm:$0xff] %v4365_v41  ;;  %v4368_v50 = vadd.f32 %v3633_v44, %v1351_v9  ;;  %v3635_v51 = vpop.f32.mrb[10].mxu1  ;;  %v3554_v52 = vpop.f32.mrb[11].mxu0 }
 0x3b7   : > { %3808 = vst [vmem:[%s5849_s21 + $0x30] sm:$0xff] %v4367_v45  ;;  %3807 = vst [vmem:[%s5849_s21 + $0x28] sm:$0xff] %v4366_v48  ;;  %v3636_v53 = vpop.f32.mrb[11].mxu1 }
 0x3b8   : > { %3809 = vst [vmem:[%s5849_s21 + $0x38] sm:$0xff] %v4368_v50 }
 0x433   : > { %v3713_v58 = vpop.f32.mrb[12].mxu0 }
 0x434   : > { %v4369_v59 = vadd.f32 %v3713_v58, %v1355_v54  ;;  %v3795_v60 = vpop.f32.mrb[12].mxu1  ;;  %v3715_v61 = vpop.f32.mrb[13].mxu0 }
 0x435   : > { %v4371_v62 = vadd.f32 %v3795_v60, %v1363_v55  ;;  %v4370_v63 = vadd.f32 %v3715_v61, %v1359_v56  ;;  %v3797_v46 = vpop.f32.mrb[13].mxu1  ;;  %v3717_v0 = vpop.f32.mrb[14].mxu0 }
 0x436   : > { %3810 = vst [vmem:[%s5849_s21 + $0x40] sm:$0xff] %v4369_v59  ;;  %v4372_v22 = vadd.f32 %v3797_v46, %v1367_v57  ;;  %v3799_v47 = vpop.f32.mrb[14].mxu1  ;;  %v3718_v1 = vpop.f32.mrb[15].mxu0 }
 0x437   : > { %3812 = vst [vmem:[%s5849_s21 + $0x50] sm:$0xff] %v4371_v62  ;;  %3811 = vst [vmem:[%s5849_s21 + $0x48] sm:$0xff] %v4370_v63  ;;  %v3800_v24 = vpop.f32.mrb[15].mxu1 }
 0x438   : > { %3813 = vst [vmem:[%s5849_s21 + $0x58] sm:$0xff] %v4372_v22 }
 0x439   : > { %5038 = shalt.err (!%p5035_p4)
}
 0x43a   : > { %s5039_s16 = scalar_lea.hbm %s5919_s1, 1536  ;;  %s5043_s23 = scalar_lea.hbm %s5979_s13, 6144 }
 0x43b   : > { %p5040_p7 = scmp.ne.s32.totalorder %s5919_s1, %s5039_s16  ;;  %p5044_p10 = scmp.lt.u32.totalorder %s5919_s1, %s5979_s13 }
 0x43c   : > { %p5045_p11 = scmp.lt.u32.totalorder %s5043_s23, %s5039_s16  ;;  %p5047_p13 = scmp.lt.u32.totalorder %s5039_s16, %s5919_s1 }
 0x43d   : > { %p5041_p8 = pnand %p5040_p7, %p5201_p5 }
 0x43e   : > { %p5046_p12 = por %p5045_p11, %p5044_p10 }
 0x43f   : > { %p5042_p9 = pneg %p5041_p8 }
 0x440   : > { %p5048_p0 = por %p5047_p13, %p5046_p12 }
 0x442   : > { %p5049_p1 = pnand %p5048_p0, %p5042_p9 }
 0x444   : > { %5052 = shalt.err (!%p5049_p1)
}
 0x445   : > { %4399 = dma.vmem_to_hbm [thread:$0]  (%p5201_p5), %s5921_s22, 1536, %s5919_s1, %s3815_s2  }
 0x446 PF: > { %p4405_p2 = scmp.ge.s32.totalorder %s5087_s28, 2  ;;  %s3841_s24 = sand.u32 1, %s5075_s25  }
 0x447   : > { %s3842_s30 = scalar_lea.sflag [#allocation3], %s3841_s24 }
 0x448   : > { %p4402_p3 = pnand %p4405_p2, %p5205_p6 }
 0x44a   : > { %5070 = dma.done.wait (!%p4402_p3), %s3842_s30, 1536  }
 0x44b   : > { %5072 = vsyncadd (!%p4402_p3), %s3842_s30, 4294965760  ;;  %s5989_s17 = sld [smem:[#allocation5_spill]]  ;;  %p23_p4 = scmp.ge.s32.totalorder %s5188_s14, 6  }
 0x44c   : > { %s5990_s25 = smov %s5079_s26  ;;  %s5991_s26 = smov %s5083_s27 }
 0x44d   : > { %s5993_s28 = smov %s5188_s14  ;;  %25 = sbr.rel (!%p23_p4) target bundleno = 7 (0x7), region = 110 }
 0x451   : > { %s5992_s27 = smov %s5989_s17 }
 0x454   :  { %3847 = vsyncpa [#allocation3], 1 }
 0x455   :  { %3849 = vsyncpa [#allocation3 + $0x1], 1 }

</bundles_post_ra>
